<compile_context>
chip_gen: v7x
topology: tpu7x:2x2x1
jax: 0.10.0
libtpu: 0.0.40
codegen_flags: <defaults>
</compile_context>

<pallas_src>
import math

import jax
import jax.numpy as jnp
from jax.experimental import pallas as pl
from jax.experimental.pallas import tpu as pltpu

NUM_HEADS = 4
LN_EPS = 1e-5

PARAM_ORDER = ("wq", "wkv", "bq", "bkv", "wo",
               "w1a", "w1b", "b1", "g1", "be1",
               "w2", "b2", "g2", "be2")


def _layernorm(x, gamma, beta):
    """Single-pass LayerNorm (f32 math): var = E[x^2] - mean^2."""
    x = x.astype(jnp.float32)
    mean = jnp.mean(x, axis=-1, keepdims=True)
    var = jnp.maximum(jnp.mean(x * x, axis=-1, keepdims=True) - mean * mean, 0.0)
    return (x - mean) * jax.lax.rsqrt(var + LN_EPS) * gamma + beta


def _make_kernel(seq_len, num_heads):
    """Kernel factory; seq_len / num_heads are compile-time constants."""

    def fusion_kernel(fwd_ref, bwd_ref,
                      wq_ref, wkv_ref, bq_ref, bkv_ref, wo_ref,
                      w1a_ref, w1b_ref, b1_ref, g1_ref, be1_ref,
                      w2_ref, b2_ref, g2_ref, be2_ref,
                      out_ref):
        M, H = fwd_ref.shape              # M = Bt * S (tall matmul M-dim)
        S = seq_len
        Bt = M // S
        hd = H // num_heads
        scale = 1.0 / math.sqrt(hd)
        cdt = fwd_ref.dtype               # compute dtype fed to the MXU

        f_act = fwd_ref[...]              # (M, H) query source
        b_act = bwd_ref[...]              # (M, H) key/value source

        # --- Fused full-width projections (MXU N-dim fully filled). ---
        q_all = (jnp.dot(f_act, wq_ref[...],
                         preferred_element_type=jnp.float32) + bq_ref[...])
        kv_all = (jnp.dot(b_act, wkv_ref[...],
                          preferred_element_type=jnp.float32) + bkv_ref[...])
        q_all = q_all.astype(cdt)         # (M, H)
        kv_all = kv_all.astype(cdt)       # (M, 2H) = [K | V]

        # --- Per-head cross attention on static lane slices of the fused
        #     projections (attention dropout = identity in eval). ---
        o_heads = []
        for h in range(num_heads):
            q = q_all[:, h * hd:(h + 1) * hd].reshape(Bt, S, hd)
            k = kv_all[:, h * hd:(h + 1) * hd].reshape(Bt, S, hd)
            v = kv_all[:, H + h * hd:H + (h + 1) * hd].reshape(Bt, S, hd)

            s = jnp.einsum("bqe,bke->bqk", q, k,
                           preferred_element_type=jnp.float32) * scale  # (Bt,S,S)
            s = s - jnp.max(s, axis=-1, keepdims=True)
            p = jnp.exp(s)
            l = jnp.sum(p, axis=-1, keepdims=True)                      # (Bt,S,1)
            o = jnp.einsum("bqk,bke->bqe", p.astype(cdt), v,
                           preferred_element_type=jnp.float32)          # (Bt,S,hd)
            # Normalize o (S*hd elems) rather than p (S*S elems); EUP recip.
            o = o * pl.reciprocal(l, approx=True)
            o_heads.append(o.reshape(M, hd))

        # Lane-axis reassembly, then a single K=H output projection.
        o_cat = jnp.concatenate(o_heads, axis=-1).astype(cdt)           # (M, H)
        attended = jnp.dot(o_cat, wo_ref[...],
                           preferred_element_type=jnp.float32)          # (M, H)
        # NOTE: output-projection bias bo is folded into b1 at prepare time.

        # --- transform: Linear(2H,2H) -> LayerNorm -> ReLU -> Dropout(id)
        #                -> Linear(2H,H) -> LayerNorm
        # combined = cat([attended, backward]); expressed as split matmuls.
        h1 = (jnp.dot(attended.astype(cdt), w1a_ref[...],
                      preferred_element_type=jnp.float32)
              + jnp.dot(b_act, w1b_ref[...],
                        preferred_element_type=jnp.float32)
              + b1_ref[...])
        h1 = _layernorm(h1, g1_ref[...], be1_ref[...])
        h1 = jnp.maximum(h1, 0.0)
        # TODO(synk): dropout layers are identity here (eval-mode semantics).
        h2 = jnp.dot(h1.astype(cdt), w2_ref[...],
                     preferred_element_type=jnp.float32) + b2_ref[...]
        h2 = _layernorm(h2, g2_ref[...], be2_ref[...])

        out_ref[...] = h2.astype(out_ref.dtype)

    return fusion_kernel


def _pick_batch_fold(batch, seq, target_rows=512):
    """Pick Bt (rows per grid step = Bt*seq).

    Constraints / preferences:
      * Bt divides batch.
      * If Bt < batch (grid > 1), Bt*seq must be a multiple of 8 (sublane
        alignment for a non-full-array block).
      * Prefer >= 2 grid steps so v7x's two TensorCores both get work.
      * Among candidates, smallest Bt with Bt*seq >= target_rows, else the
        largest candidate.
    """
    divisors = [d for d in range(1, batch + 1) if batch % d == 0]
    valid = [d for d in divisors if d == batch or (d * seq) % 8 == 0]
    multi = [d for d in valid if d < batch]
    pool = multi if multi else valid
    for d in pool:
        if d * seq >= target_rows:
            return d
    return pool[-1]


def _vmem_limit_bytes():
    """Per-generation scoped-VMEM budget (leave headroom on v7x's 64 MiB/TC)."""
    try:
        cap = pltpu.get_tpu_info().vmem_capacity_bytes
    except Exception:
        cap = None
    if cap is not None and cap >= 100 * 1024 * 1024:   # v5e / v6e: 128 MiB
        return 64 * 1024 * 1024
    return 40 * 1024 * 1024                            # v7x: 64 MiB per TC


def prepare_params(params, compute_dtype=jnp.float32):
    """Fuse K/V weights, split the concat-Linear, fold bo into b1, cast."""
    H = params["wq"].shape[0]
    c = lambda x: x.astype(compute_dtype)
    f32 = lambda x: x.astype(jnp.float32)
    w1a = params["w1"][:H, :]          # multiplies attended_forward
    w1b = params["w1"][H:, :]          # multiplies backward_features
    b1_fold = params["b1"] + params["bo"] @ w1a   # fold attention output bias
    return {
        "wq": c(params["wq"]),
        "wkv": c(jnp.concatenate([params["wk"], params["wv"]], axis=1)),
        "bq": f32(params["bq"]),
        "bkv": f32(jnp.concatenate([params["bk"], params["bv"]], axis=1)),
        "wo": c(params["wo"]),
        "w1a": c(w1a), "w1b": c(w1b),
        "b1": f32(b1_fold), "g1": f32(params["g1"]), "be1": f32(params["be1"]),
        "w2": c(params["w2"]),
        "b2": f32(params["b2"]), "g2": f32(params["g2"]), "be2": f32(params["be2"]),
    }


def directional_feature_fusion(fwd, bwd, prepped, *, target_rows=512):
    B, S, H = fwd.shape
    assert H % NUM_HEADS == 0
    Bt = _pick_batch_fold(B, S, target_rows)
    M = Bt * S
    param_list = [prepped[k] for k in PARAM_ORDER]

    # Flatten batch/seq at the XLA level so every in-kernel matmul sees a tall
    # (M, H) slab; the kernel never reshapes the (possibly bf16) inputs.
    fwd2 = fwd.reshape(B * S, H)
    bwd2 = bwd.reshape(B * S, H)

    act_spec = pl.BlockSpec((M, H), lambda i: (i, 0))

    def build(single_buffer_weights):
        if single_buffer_weights:
            # Weights are grid-invariant: single-buffer them to free VMEM.
            param_specs = [
                pl.BlockSpec(p.shape, (lambda i, nd=p.ndim: (0,) * nd),
                             pipeline_mode=pl.Buffered(1))
                for p in param_list]
        else:
            param_specs = [
                pl.BlockSpec(p.shape, (lambda i, nd=p.ndim: (0,) * nd))
                for p in param_list]
        return pl.pallas_call(
            _make_kernel(S, NUM_HEADS),
            out_shape=jax.ShapeDtypeStruct((B * S, H), fwd.dtype),
            grid_spec=pltpu.PrefetchScalarGridSpec(
                num_scalar_prefetch=0,
                grid=(B // Bt,),
                in_specs=[act_spec, act_spec] + param_specs,
                out_specs=act_spec,
            ),
            compiler_params=pltpu.CompilerParams(
                dimension_semantics=("parallel",),   # batch steps independent
                vmem_limit_bytes=_vmem_limit_bytes(),
            ),
        )

    try:
        out2 = build(True)(fwd2, bwd2, *param_list)
    except Exception:
        # TODO(synk): single-buffered (pl.Buffered(1)) weight specs unsupported
        # on this build; fall back to default double-buffered weights.
        out2 = build(False)(fwd2, bwd2, *param_list)
    return out2.reshape(B, S, H)


def init_params(key, hidden_dim):
    H = hidden_dim
    ks = jax.random.split(key, 10)
    s = 0.08
    return {
        # attention projections, stored transposed: y = x @ W + b
        "wq": jax.random.normal(ks[0], (H, H), jnp.float32) * s,
        "wk": jax.random.normal(ks[1], (H, H), jnp.float32) * s,
        "wv": jax.random.normal(ks[2], (H, H), jnp.float32) * s,
        "bq": jax.random.normal(ks[3], (1, H), jnp.float32) * 0.01,
        "bk": jax.random.normal(ks[4], (1, H), jnp.float32) * 0.01,
        "bv": jax.random.normal(ks[5], (1, H), jnp.float32) * 0.01,
        "wo": jax.random.normal(ks[6], (H, H), jnp.float32) * s,
        "bo": jax.random.normal(ks[8], (1, H), jnp.float32) * 0.01,
        # transform MLP
        "w1": jax.random.normal(ks[7], (2 * H, 2 * H), jnp.float32) * s,
        "b1": jnp.zeros((1, 2 * H), jnp.float32),
        "g1": jnp.ones((1, 2 * H), jnp.float32),
        "be1": jnp.zeros((1, 2 * H), jnp.float32),
        "w2": jax.random.normal(ks[9], (2 * H, H), jnp.float32) * s,
        "b2": jnp.zeros((1, H), jnp.float32),
        "g2": jnp.ones((1, H), jnp.float32),
        "be2": jnp.zeros((1, H), jnp.float32),
    }


def reference_jax(fwd, bwd, params):
    """Pure-JAX f32 reference of the same (eval-mode) forward pass."""
    B, S, H = fwd.shape
    hd = H // NUM_HEADS
    q = fwd @ params["wq"] + params["bq"]
    k = bwd @ params["wk"] + params["bk"]
    v = bwd @ params["wv"] + params["bv"]

    def split(x):  # [B,S,H] -> [B,NH,S,hd]
        return x.reshape(B, S, NUM_HEADS, hd).transpose(0, 2, 1, 3)

    qh, kh, vh = split(q), split(k), split(v)
    scores = jnp.einsum("bhqd,bhkd->bhqk", qh, kh) / math.sqrt(hd)
    p = jax.nn.softmax(scores, axis=-1)
    o = jnp.einsum("bhqk,bhkd->bhqd", p, vh)
    o = o.transpose(0, 2, 1, 3).reshape(B, S, H)
    attended = o @ params["wo"] + params["bo"]

    combined = jnp.concatenate([attended, bwd], axis=-1)
    h1 = combined @ params["w1"] + params["b1"]
    m = h1.mean(-1, keepdims=True)
    var = ((h1 - m) ** 2).mean(-1, keepdims=True)
    h1 = (h1 - m) * jax.lax.rsqrt(var + LN_EPS) * params["g1"] + params["be1"]
    h1 = jnp.maximum(h1, 0.0)
    h2 = h1 @ params["w2"] + params["b2"]
    m = h2.mean(-1, keepdims=True)
    var = ((h2 - m) ** 2).mean(-1, keepdims=True)
    h2 = (h2 - m) * jax.lax.rsqrt(var + LN_EPS) * params["g2"] + params["be2"]
    return h2


if __name__ == "__main__":
    B, S, H = 2, 8, 32  # batch, seq, hidden (hidden divisible by 4 heads)
    key = jax.random.PRNGKey(0)
    k1, k2, k3 = jax.random.split(key, 3)
    fwd = jax.random.normal(k1, (B, S, H), jnp.float32)
    bwd = jax.random.normal(k2, (B, S, H), jnp.float32)
    params = init_params(k3, H)
    ref = jax.block_until_ready(reference_jax(fwd, bwd, params))

    # --- f32 compute path (tolerance accounts for the approx EUP reciprocal
    #     in the softmax normalization; output is layer-normalized, O(1)). ---
    pf32 = prepare_params(params, jnp.float32)
    out = jax.block_until_ready(directional_feature_fusion(fwd, bwd, pf32))
    assert out.shape == (B, S, H)
    assert bool(jnp.all(jnp.isfinite(out)))
    err = float(jnp.max(jnp.abs(out - ref)))
    assert err < 2e-2, err

    # --- bf16 compute path (bf16 MXU operands, f32 accumulation / LN math) ---
    pbf16 = prepare_params(params, jnp.bfloat16)
    out_bf = jax.block_until_ready(
        directional_feature_fusion(fwd.astype(jnp.bfloat16),
                                   bwd.astype(jnp.bfloat16), pbf16))
    out_bf = out_bf.astype(jnp.float32)
    assert bool(jnp.all(jnp.isfinite(out_bf)))
    err_bf = float(jnp.max(jnp.abs(out_bf - ref)))
    assert err_bf < 2e-1, err_bf

    print("KERNEL_OK")
</pallas_src>

<mosaic_0001>
module attributes {stable_mosaic.version = 11 : i64} {
  func.func @fusion_kernel(%arg0: i32, %arg1: memref<8x32xf32, #tpu.memory_space<vmem>>, %arg2: memref<8x32xf32, #tpu.memory_space<vmem>>, %arg3: memref<32x32xf32, #tpu.memory_space<vmem>>, %arg4: memref<32x64xf32, #tpu.memory_space<vmem>>, %arg5: memref<1x32xf32, #tpu.memory_space<vmem>>, %arg6: memref<1x64xf32, #tpu.memory_space<vmem>>, %arg7: memref<32x32xf32, #tpu.memory_space<vmem>>, %arg8: memref<32x64xf32, #tpu.memory_space<vmem>>, %arg9: memref<32x64xf32, #tpu.memory_space<vmem>>, %arg10: memref<1x64xf32, #tpu.memory_space<vmem>>, %arg11: memref<1x64xf32, #tpu.memory_space<vmem>>, %arg12: memref<1x64xf32, #tpu.memory_space<vmem>>, %arg13: memref<64x32xf32, #tpu.memory_space<vmem>>, %arg14: memref<1x32xf32, #tpu.memory_space<vmem>>, %arg15: memref<1x32xf32, #tpu.memory_space<vmem>>, %arg16: memref<1x32xf32, #tpu.memory_space<vmem>>, %arg17: memref<8x32xf32, #tpu.memory_space<vmem>>) attributes {dimension_semantics = [#tpu.dimension_semantics<parallel>], iteration_bounds = array<i64: 2>, scalar_prefetch = 0 : i64, scratch_operands = 0 : i64, tpu.core_type = #tpu.core_type<tc>, window_params = [{transform_indices = @transform_0, window_bounds = array<i64: 8, 32>}, {transform_indices = @transform_1, window_bounds = array<i64: 8, 32>}, {pipeline_mode = #tpu.pipeline_mode<synchronous>, transform_indices = @transform_2, window_bounds = array<i64: 32, 32>}, {pipeline_mode = #tpu.pipeline_mode<synchronous>, transform_indices = @transform_3, window_bounds = array<i64: 32, 64>}, {pipeline_mode = #tpu.pipeline_mode<synchronous>, transform_indices = @transform_4, window_bounds = array<i64: 1, 32>}, {pipeline_mode = #tpu.pipeline_mode<synchronous>, transform_indices = @transform_5, window_bounds = array<i64: 1, 64>}, {pipeline_mode = #tpu.pipeline_mode<synchronous>, transform_indices = @transform_6, window_bounds = array<i64: 32, 32>}, {pipeline_mode = #tpu.pipeline_mode<synchronous>, transform_indices = @transform_7, window_bounds = array<i64: 32, 64>}, {pipeline_mode = #tpu.pipeline_mode<synchronous>, transform_indices = @transform_8, window_bounds = array<i64: 32, 64>}, {pipeline_mode = #tpu.pipeline_mode<synchronous>, transform_indices = @transform_9, window_bounds = array<i64: 1, 64>}, {pipeline_mode = #tpu.pipeline_mode<synchronous>, transform_indices = @transform_10, window_bounds = array<i64: 1, 64>}, {pipeline_mode = #tpu.pipeline_mode<synchronous>, transform_indices = @transform_11, window_bounds = array<i64: 1, 64>}, {pipeline_mode = #tpu.pipeline_mode<synchronous>, transform_indices = @transform_12, window_bounds = array<i64: 64, 32>}, {pipeline_mode = #tpu.pipeline_mode<synchronous>, transform_indices = @transform_13, window_bounds = array<i64: 1, 32>}, {pipeline_mode = #tpu.pipeline_mode<synchronous>, transform_indices = @transform_14, window_bounds = array<i64: 1, 32>}, {pipeline_mode = #tpu.pipeline_mode<synchronous>, transform_indices = @transform_15, window_bounds = array<i64: 1, 32>}, {transform_indices = @transform_16, window_bounds = array<i64: 8, 32>}]} {
    %c0 = arith.constant 0 : index
    %c0_0 = arith.constant 0 : index
    %0 = vector.load %arg1[%c0, %c0_0] : memref<8x32xf32, #tpu.memory_space<vmem>>, vector<8x32xf32>
    %c0_1 = arith.constant 0 : index
    %c0_2 = arith.constant 0 : index
    %1 = vector.load %arg2[%c0_1, %c0_2] : memref<8x32xf32, #tpu.memory_space<vmem>>, vector<8x32xf32>
    %c0_3 = arith.constant 0 : index
    %c0_4 = arith.constant 0 : index
    %2 = vector.load %arg3[%c0_3, %c0_4] : memref<32x32xf32, #tpu.memory_space<vmem>>, vector<32x32xf32>
    %cst = arith.constant dense<0.000000e+00> : vector<8x32xf32>
    %3 = tpu.matmul %0, %2, %cst {dimension_numbers = #tpu.dot_dimension_numbers<[1], [0], [0], [1], [0, 0, 1, 1], [], []>} : vector<8x32xf32>, vector<32x32xf32>, vector<8x32xf32> -> vector<8x32xf32>
    %c0_5 = arith.constant 0 : index
    %c0_6 = arith.constant 0 : index
    %4 = vector.load %arg5[%c0_5, %c0_6] : memref<1x32xf32, #tpu.memory_space<vmem>>, vector<1x32xf32>
    %5 = vector.broadcast %4 : vector<1x32xf32> to vector<8x32xf32>
    %6 = arith.addf %3, %5 : vector<8x32xf32>
    %c0_7 = arith.constant 0 : index
    %c0_8 = arith.constant 0 : index
    %7 = vector.load %arg4[%c0_7, %c0_8] : memref<32x64xf32, #tpu.memory_space<vmem>>, vector<32x64xf32>
    %cst_9 = arith.constant dense<0.000000e+00> : vector<8x64xf32>
    %8 = tpu.matmul %1, %7, %cst_9 {dimension_numbers = #tpu.dot_dimension_numbers<[1], [0], [0], [1], [0, 0, 1, 1], [], []>} : vector<8x32xf32>, vector<32x64xf32>, vector<8x64xf32> -> vector<8x64xf32>
    %c0_10 = arith.constant 0 : index
    %c0_11 = arith.constant 0 : index
    %9 = vector.load %arg6[%c0_10, %c0_11] : memref<1x64xf32, #tpu.memory_space<vmem>>, vector<1x64xf32>
    %10 = vector.broadcast %9 : vector<1x64xf32> to vector<8x64xf32>
    %11 = arith.addf %8, %10 : vector<8x64xf32>
    %12 = vector.extract_strided_slice %6 {offsets = [0, 0], sizes = [8, 8], strides = [1, 1]} : vector<8x32xf32> to vector<8x8xf32>
    %13 = vector.shape_cast %12 : vector<8x8xf32> to vector<1x8x8xf32>
    %14 = vector.extract_strided_slice %11 {offsets = [0, 0], sizes = [8, 8], strides = [1, 1]} : vector<8x64xf32> to vector<8x8xf32>
    %15 = vector.shape_cast %14 : vector<8x8xf32> to vector<1x8x8xf32>
    %16 = vector.extract_strided_slice %11 {offsets = [0, 32], sizes = [8, 8], strides = [1, 1]} : vector<8x64xf32> to vector<8x8xf32>
    %17 = vector.shape_cast %16 : vector<8x8xf32> to vector<1x8x8xf32>
    "tpu.trace_start"() <{level = 10 : i32, message = "bqe,bke->bqk"}> : () -> ()
    %cst_12 = arith.constant dense<0.000000e+00> : vector<1x8x8xf32>
    %18 = tpu.matmul %13, %15, %cst_12 {dimension_numbers = #tpu.dot_dimension_numbers<[2], [2], [1], [1], [0, 0, 0, 1, 1, 1], [0], [0]>} : vector<1x8x8xf32>, vector<1x8x8xf32>, vector<1x8x8xf32> -> vector<1x8x8xf32>
    "tpu.trace_stop"() : () -> ()
    %cst_13 = arith.constant 0.353553385 : f32
    %19 = vector.broadcast %cst_13 : f32 to vector<1x8x8xf32>
    %20 = arith.mulf %18, %19 : vector<1x8x8xf32>
    %cst_14 = arith.constant dense<0xFF800000> : vector<1x8xf32>
    %21 = vector.multi_reduction <maximumf>, %20, %cst_14 [2] : vector<1x8x8xf32> to vector<1x8xf32>
    %22 = vector.shape_cast %21 : vector<1x8xf32> to vector<1x8x1xf32>
    %23 = vector.broadcast %22 : vector<1x8x1xf32> to vector<1x8x8xf32>
    %24 = arith.subf %20, %23 : vector<1x8x8xf32>
    %25 = math.exp %24 : vector<1x8x8xf32>
    %cst_15 = arith.constant dense<0.000000e+00> : vector<1x8xf32>
    %26 = vector.multi_reduction <add>, %25, %cst_15 [2] : vector<1x8x8xf32> to vector<1x8xf32>
    %27 = vector.shape_cast %26 : vector<1x8xf32> to vector<1x8x1xf32>
    "tpu.trace_start"() <{level = 10 : i32, message = "bqk,bke->bqe"}> : () -> ()
    %cst_16 = arith.constant dense<0.000000e+00> : vector<1x8x8xf32>
    %28 = tpu.matmul %25, %17, %cst_16 {dimension_numbers = #tpu.dot_dimension_numbers<[2], [1], [1], [2], [0, 0, 0, 1, 1, 2], [0], [0]>} : vector<1x8x8xf32>, vector<1x8x8xf32>, vector<1x8x8xf32> -> vector<1x8x8xf32>
    "tpu.trace_stop"() : () -> ()
    %29 = tpu.reciprocal %27 {approx = true} : vector<1x8x1xf32> -> vector<1x8x1xf32>
    %30 = vector.broadcast %29 : vector<1x8x1xf32> to vector<1x8x8xf32>
    %31 = arith.mulf %28, %30 : vector<1x8x8xf32>
    %32 = vector.shape_cast %31 : vector<1x8x8xf32> to vector<8x8xf32>
    %33 = vector.extract_strided_slice %6 {offsets = [0, 8], sizes = [8, 8], strides = [1, 1]} : vector<8x32xf32> to vector<8x8xf32>
    %34 = vector.shape_cast %33 : vector<8x8xf32> to vector<1x8x8xf32>
    %35 = vector.extract_strided_slice %11 {offsets = [0, 8], sizes = [8, 8], strides = [1, 1]} : vector<8x64xf32> to vector<8x8xf32>
    %36 = vector.shape_cast %35 : vector<8x8xf32> to vector<1x8x8xf32>
    %37 = vector.extract_strided_slice %11 {offsets = [0, 40], sizes = [8, 8], strides = [1, 1]} : vector<8x64xf32> to vector<8x8xf32>
    %38 = vector.shape_cast %37 : vector<8x8xf32> to vector<1x8x8xf32>
    "tpu.trace_start"() <{level = 10 : i32, message = "bqe,bke->bqk"}> : () -> ()
    %cst_17 = arith.constant dense<0.000000e+00> : vector<1x8x8xf32>
    %39 = tpu.matmul %34, %36, %cst_17 {dimension_numbers = #tpu.dot_dimension_numbers<[2], [2], [1], [1], [0, 0, 0, 1, 1, 1], [0], [0]>} : vector<1x8x8xf32>, vector<1x8x8xf32>, vector<1x8x8xf32> -> vector<1x8x8xf32>
    "tpu.trace_stop"() : () -> ()
    %cst_18 = arith.constant 0.353553385 : f32
    %40 = vector.broadcast %cst_18 : f32 to vector<1x8x8xf32>
    %41 = arith.mulf %39, %40 : vector<1x8x8xf32>
    %cst_19 = arith.constant dense<0xFF800000> : vector<1x8xf32>
    %42 = vector.multi_reduction <maximumf>, %41, %cst_19 [2] : vector<1x8x8xf32> to vector<1x8xf32>
    %43 = vector.shape_cast %42 : vector<1x8xf32> to vector<1x8x1xf32>
    %44 = vector.broadcast %43 : vector<1x8x1xf32> to vector<1x8x8xf32>
    %45 = arith.subf %41, %44 : vector<1x8x8xf32>
    %46 = math.exp %45 : vector<1x8x8xf32>
    %cst_20 = arith.constant dense<0.000000e+00> : vector<1x8xf32>
    %47 = vector.multi_reduction <add>, %46, %cst_20 [2] : vector<1x8x8xf32> to vector<1x8xf32>
    %48 = vector.shape_cast %47 : vector<1x8xf32> to vector<1x8x1xf32>
    "tpu.trace_start"() <{level = 10 : i32, message = "bqk,bke->bqe"}> : () -> ()
    %cst_21 = arith.constant dense<0.000000e+00> : vector<1x8x8xf32>
    %49 = tpu.matmul %46, %38, %cst_21 {dimension_numbers = #tpu.dot_dimension_numbers<[2], [1], [1], [2], [0, 0, 0, 1, 1, 2], [0], [0]>} : vector<1x8x8xf32>, vector<1x8x8xf32>, vector<1x8x8xf32> -> vector<1x8x8xf32>
    "tpu.trace_stop"() : () -> ()
    %50 = tpu.reciprocal %48 {approx = true} : vector<1x8x1xf32> -> vector<1x8x1xf32>
    %51 = vector.broadcast %50 : vector<1x8x1xf32> to vector<1x8x8xf32>
    %52 = arith.mulf %49, %51 : vector<1x8x8xf32>
    %53 = vector.shape_cast %52 : vector<1x8x8xf32> to vector<8x8xf32>
    %54 = vector.extract_strided_slice %6 {offsets = [0, 16], sizes = [8, 8], strides = [1, 1]} : vector<8x32xf32> to vector<8x8xf32>
    %55 = vector.shape_cast %54 : vector<8x8xf32> to vector<1x8x8xf32>
    %56 = vector.extract_strided_slice %11 {offsets = [0, 16], sizes = [8, 8], strides = [1, 1]} : vector<8x64xf32> to vector<8x8xf32>
    %57 = vector.shape_cast %56 : vector<8x8xf32> to vector<1x8x8xf32>
    %58 = vector.extract_strided_slice %11 {offsets = [0, 48], sizes = [8, 8], strides = [1, 1]} : vector<8x64xf32> to vector<8x8xf32>
    %59 = vector.shape_cast %58 : vector<8x8xf32> to vector<1x8x8xf32>
    "tpu.trace_start"() <{level = 10 : i32, message = "bqe,bke->bqk"}> : () -> ()
    %cst_22 = arith.constant dense<0.000000e+00> : vector<1x8x8xf32>
    %60 = tpu.matmul %55, %57, %cst_22 {dimension_numbers = #tpu.dot_dimension_numbers<[2], [2], [1], [1], [0, 0, 0, 1, 1, 1], [0], [0]>} : vector<1x8x8xf32>, vector<1x8x8xf32>, vector<1x8x8xf32> -> vector<1x8x8xf32>
    "tpu.trace_stop"() : () -> ()
    %cst_23 = arith.constant 0.353553385 : f32
    %61 = vector.broadcast %cst_23 : f32 to vector<1x8x8xf32>
    %62 = arith.mulf %60, %61 : vector<1x8x8xf32>
    %cst_24 = arith.constant dense<0xFF800000> : vector<1x8xf32>
    %63 = vector.multi_reduction <maximumf>, %62, %cst_24 [2] : vector<1x8x8xf32> to vector<1x8xf32>
    %64 = vector.shape_cast %63 : vector<1x8xf32> to vector<1x8x1xf32>
    %65 = vector.broadcast %64 : vector<1x8x1xf32> to vector<1x8x8xf32>
    %66 = arith.subf %62, %65 : vector<1x8x8xf32>
    %67 = math.exp %66 : vector<1x8x8xf32>
    %cst_25 = arith.constant dense<0.000000e+00> : vector<1x8xf32>
    %68 = vector.multi_reduction <add>, %67, %cst_25 [2] : vector<1x8x8xf32> to vector<1x8xf32>
    %69 = vector.shape_cast %68 : vector<1x8xf32> to vector<1x8x1xf32>
    "tpu.trace_start"() <{level = 10 : i32, message = "bqk,bke->bqe"}> : () -> ()
    %cst_26 = arith.constant dense<0.000000e+00> : vector<1x8x8xf32>
    %70 = tpu.matmul %67, %59, %cst_26 {dimension_numbers = #tpu.dot_dimension_numbers<[2], [1], [1], [2], [0, 0, 0, 1, 1, 2], [0], [0]>} : vector<1x8x8xf32>, vector<1x8x8xf32>, vector<1x8x8xf32> -> vector<1x8x8xf32>
    "tpu.trace_stop"() : () -> ()
    %71 = tpu.reciprocal %69 {approx = true} : vector<1x8x1xf32> -> vector<1x8x1xf32>
    %72 = vector.broadcast %71 : vector<1x8x1xf32> to vector<1x8x8xf32>
    %73 = arith.mulf %70, %72 : vector<1x8x8xf32>
    %74 = vector.shape_cast %73 : vector<1x8x8xf32> to vector<8x8xf32>
    %75 = vector.extract_strided_slice %6 {offsets = [0, 24], sizes = [8, 8], strides = [1, 1]} : vector<8x32xf32> to vector<8x8xf32>
    %76 = vector.shape_cast %75 : vector<8x8xf32> to vector<1x8x8xf32>
    %77 = vector.extract_strided_slice %11 {offsets = [0, 24], sizes = [8, 8], strides = [1, 1]} : vector<8x64xf32> to vector<8x8xf32>
    %78 = vector.shape_cast %77 : vector<8x8xf32> to vector<1x8x8xf32>
    %79 = vector.extract_strided_slice %11 {offsets = [0, 56], sizes = [8, 8], strides = [1, 1]} : vector<8x64xf32> to vector<8x8xf32>
    %80 = vector.shape_cast %79 : vector<8x8xf32> to vector<1x8x8xf32>
    "tpu.trace_start"() <{level = 10 : i32, message = "bqe,bke->bqk"}> : () -> ()
    %cst_27 = arith.constant dense<0.000000e+00> : vector<1x8x8xf32>
    %81 = tpu.matmul %76, %78, %cst_27 {dimension_numbers = #tpu.dot_dimension_numbers<[2], [2], [1], [1], [0, 0, 0, 1, 1, 1], [0], [0]>} : vector<1x8x8xf32>, vector<1x8x8xf32>, vector<1x8x8xf32> -> vector<1x8x8xf32>
    "tpu.trace_stop"() : () -> ()
    %cst_28 = arith.constant 0.353553385 : f32
    %82 = vector.broadcast %cst_28 : f32 to vector<1x8x8xf32>
    %83 = arith.mulf %81, %82 : vector<1x8x8xf32>
    %cst_29 = arith.constant dense<0xFF800000> : vector<1x8xf32>
    %84 = vector.multi_reduction <maximumf>, %83, %cst_29 [2] : vector<1x8x8xf32> to vector<1x8xf32>
    %85 = vector.shape_cast %84 : vector<1x8xf32> to vector<1x8x1xf32>
    %86 = vector.broadcast %85 : vector<1x8x1xf32> to vector<1x8x8xf32>
    %87 = arith.subf %83, %86 : vector<1x8x8xf32>
    %88 = math.exp %87 : vector<1x8x8xf32>
    %cst_30 = arith.constant dense<0.000000e+00> : vector<1x8xf32>
    %89 = vector.multi_reduction <add>, %88, %cst_30 [2] : vector<1x8x8xf32> to vector<1x8xf32>
    %90 = vector.shape_cast %89 : vector<1x8xf32> to vector<1x8x1xf32>
    "tpu.trace_start"() <{level = 10 : i32, message = "bqk,bke->bqe"}> : () -> ()
    %cst_31 = arith.constant dense<0.000000e+00> : vector<1x8x8xf32>
    %91 = tpu.matmul %88, %80, %cst_31 {dimension_numbers = #tpu.dot_dimension_numbers<[2], [1], [1], [2], [0, 0, 0, 1, 1, 2], [0], [0]>} : vector<1x8x8xf32>, vector<1x8x8xf32>, vector<1x8x8xf32> -> vector<1x8x8xf32>
    "tpu.trace_stop"() : () -> ()
    %92 = tpu.reciprocal %90 {approx = true} : vector<1x8x1xf32> -> vector<1x8x1xf32>
    %93 = vector.broadcast %92 : vector<1x8x1xf32> to vector<1x8x8xf32>
    %94 = arith.mulf %91, %93 : vector<1x8x8xf32>
    %95 = vector.shape_cast %94 : vector<1x8x8xf32> to vector<8x8xf32>
    %96 = tpu.concatenate %32, %53, %74, %95 in 1 : vector<8x8xf32>, vector<8x8xf32>, vector<8x8xf32>, vector<8x8xf32> -> vector<8x32xf32>
    %c0_32 = arith.constant 0 : index
    %c0_33 = arith.constant 0 : index
    %97 = vector.load %arg7[%c0_32, %c0_33] : memref<32x32xf32, #tpu.memory_space<vmem>>, vector<32x32xf32>
    %cst_34 = arith.constant dense<0.000000e+00> : vector<8x32xf32>
    %98 = tpu.matmul %96, %97, %cst_34 {dimension_numbers = #tpu.dot_dimension_numbers<[1], [0], [0], [1], [0, 0, 1, 1], [], []>} : vector<8x32xf32>, vector<32x32xf32>, vector<8x32xf32> -> vector<8x32xf32>
    %c0_35 = arith.constant 0 : index
    %c0_36 = arith.constant 0 : index
    %99 = vector.load %arg8[%c0_35, %c0_36] : memref<32x64xf32, #tpu.memory_space<vmem>>, vector<32x64xf32>
    %cst_37 = arith.constant dense<0.000000e+00> : vector<8x64xf32>
    %100 = tpu.matmul %98, %99, %cst_37 {dimension_numbers = #tpu.dot_dimension_numbers<[1], [0], [0], [1], [0, 0, 1, 1], [], []>} : vector<8x32xf32>, vector<32x64xf32>, vector<8x64xf32> -> vector<8x64xf32>
    %c0_38 = arith.constant 0 : index
    %c0_39 = arith.constant 0 : index
    %101 = vector.load %arg9[%c0_38, %c0_39] : memref<32x64xf32, #tpu.memory_space<vmem>>, vector<32x64xf32>
    %cst_40 = arith.constant dense<0.000000e+00> : vector<8x64xf32>
    %102 = tpu.matmul %1, %101, %cst_40 {dimension_numbers = #tpu.dot_dimension_numbers<[1], [0], [0], [1], [0, 0, 1, 1], [], []>} : vector<8x32xf32>, vector<32x64xf32>, vector<8x64xf32> -> vector<8x64xf32>
    %103 = arith.addf %100, %102 : vector<8x64xf32>
    %c0_41 = arith.constant 0 : index
    %c0_42 = arith.constant 0 : index
    %104 = vector.load %arg10[%c0_41, %c0_42] : memref<1x64xf32, #tpu.memory_space<vmem>>, vector<1x64xf32>
    %105 = vector.broadcast %104 : vector<1x64xf32> to vector<8x64xf32>
    %106 = arith.addf %103, %105 : vector<8x64xf32>
    %c0_43 = arith.constant 0 : index
    %c0_44 = arith.constant 0 : index
    %107 = vector.load %arg11[%c0_43, %c0_44] : memref<1x64xf32, #tpu.memory_space<vmem>>, vector<1x64xf32>
    %c0_45 = arith.constant 0 : index
    %c0_46 = arith.constant 0 : index
    %108 = vector.load %arg12[%c0_45, %c0_46] : memref<1x64xf32, #tpu.memory_space<vmem>>, vector<1x64xf32>
    %cst_47 = arith.constant dense<0.000000e+00> : vector<8xf32>
    %109 = vector.multi_reduction <add>, %106, %cst_47 [1] : vector<8x64xf32> to vector<8xf32>
    %110 = vector.shape_cast %109 : vector<8xf32> to vector<8x1xf32>
    %cst_48 = arith.constant 6.400000e+01 : f32
    %111 = vector.broadcast %cst_48 : f32 to vector<8x1xf32>
    %112 = arith.divf %110, %111 : vector<8x1xf32>
    %113 = arith.mulf %106, %106 : vector<8x64xf32>
    %cst_49 = arith.constant dense<0.000000e+00> : vector<8xf32>
    %114 = vector.multi_reduction <add>, %113, %cst_49 [1] : vector<8x64xf32> to vector<8xf32>
    %115 = vector.shape_cast %114 : vector<8xf32> to vector<8x1xf32>
    %cst_50 = arith.constant 6.400000e+01 : f32
    %116 = vector.broadcast %cst_50 : f32 to vector<8x1xf32>
    %117 = arith.divf %115, %116 : vector<8x1xf32>
    %118 = arith.mulf %112, %112 : vector<8x1xf32>
    %119 = arith.subf %117, %118 : vector<8x1xf32>
    %cst_51 = arith.constant 0.000000e+00 : f32
    %120 = vector.broadcast %cst_51 : f32 to vector<8x1xf32>
    %121 = arith.maximumf %119, %120 : vector<8x1xf32>
    %122 = vector.broadcast %112 : vector<8x1xf32> to vector<8x64xf32>
    %123 = arith.subf %106, %122 : vector<8x64xf32>
    %cst_52 = arith.constant 9.99999974E-6 : f32
    %124 = vector.broadcast %cst_52 : f32 to vector<8x1xf32>
    %125 = arith.addf %121, %124 : vector<8x1xf32>
    %126 = math.rsqrt %125 : vector<8x1xf32>
    %127 = vector.broadcast %126 : vector<8x1xf32> to vector<8x64xf32>
    %128 = arith.mulf %123, %127 : vector<8x64xf32>
    %129 = vector.broadcast %107 : vector<1x64xf32> to vector<8x64xf32>
    %130 = arith.mulf %128, %129 : vector<8x64xf32>
    %131 = vector.broadcast %108 : vector<1x64xf32> to vector<8x64xf32>
    %132 = arith.addf %130, %131 : vector<8x64xf32>
    %cst_53 = arith.constant 0.000000e+00 : f32
    %133 = vector.broadcast %cst_53 : f32 to vector<8x64xf32>
    %134 = arith.maximumf %132, %133 : vector<8x64xf32>
    %c0_54 = arith.constant 0 : index
    %c0_55 = arith.constant 0 : index
    %135 = vector.load %arg13[%c0_54, %c0_55] : memref<64x32xf32, #tpu.memory_space<vmem>>, vector<64x32xf32>
    %cst_56 = arith.constant dense<0.000000e+00> : vector<8x32xf32>
    %136 = tpu.matmul %134, %135, %cst_56 {dimension_numbers = #tpu.dot_dimension_numbers<[1], [0], [0], [1], [0, 0, 1, 1], [], []>} : vector<8x64xf32>, vector<64x32xf32>, vector<8x32xf32> -> vector<8x32xf32>
    %c0_57 = arith.constant 0 : index
    %c0_58 = arith.constant 0 : index
    %137 = vector.load %arg14[%c0_57, %c0_58] : memref<1x32xf32, #tpu.memory_space<vmem>>, vector<1x32xf32>
    %138 = vector.broadcast %137 : vector<1x32xf32> to vector<8x32xf32>
    %139 = arith.addf %136, %138 : vector<8x32xf32>
    %c0_59 = arith.constant 0 : index
    %c0_60 = arith.constant 0 : index
    %140 = vector.load %arg15[%c0_59, %c0_60] : memref<1x32xf32, #tpu.memory_space<vmem>>, vector<1x32xf32>
    %c0_61 = arith.constant 0 : index
    %c0_62 = arith.constant 0 : index
    %141 = vector.load %arg16[%c0_61, %c0_62] : memref<1x32xf32, #tpu.memory_space<vmem>>, vector<1x32xf32>
    %cst_63 = arith.constant dense<0.000000e+00> : vector<8xf32>
    %142 = vector.multi_reduction <add>, %139, %cst_63 [1] : vector<8x32xf32> to vector<8xf32>
    %143 = vector.shape_cast %142 : vector<8xf32> to vector<8x1xf32>
    %cst_64 = arith.constant 3.200000e+01 : f32
    %144 = vector.broadcast %cst_64 : f32 to vector<8x1xf32>
    %145 = arith.divf %143, %144 : vector<8x1xf32>
    %146 = arith.mulf %139, %139 : vector<8x32xf32>
    %cst_65 = arith.constant dense<0.000000e+00> : vector<8xf32>
    %147 = vector.multi_reduction <add>, %146, %cst_65 [1] : vector<8x32xf32> to vector<8xf32>
    %148 = vector.shape_cast %147 : vector<8xf32> to vector<8x1xf32>
    %cst_66 = arith.constant 3.200000e+01 : f32
    %149 = vector.broadcast %cst_66 : f32 to vector<8x1xf32>
    %150 = arith.divf %148, %149 : vector<8x1xf32>
    %151 = arith.mulf %145, %145 : vector<8x1xf32>
    %152 = arith.subf %150, %151 : vector<8x1xf32>
    %cst_67 = arith.constant 0.000000e+00 : f32
    %153 = vector.broadcast %cst_67 : f32 to vector<8x1xf32>
    %154 = arith.maximumf %152, %153 : vector<8x1xf32>
    %155 = vector.broadcast %145 : vector<8x1xf32> to vector<8x32xf32>
    %156 = arith.subf %139, %155 : vector<8x32xf32>
    %cst_68 = arith.constant 9.99999974E-6 : f32
    %157 = vector.broadcast %cst_68 : f32 to vector<8x1xf32>
    %158 = arith.addf %154, %157 : vector<8x1xf32>
    %159 = math.rsqrt %158 : vector<8x1xf32>
    %160 = vector.broadcast %159 : vector<8x1xf32> to vector<8x32xf32>
    %161 = arith.mulf %156, %160 : vector<8x32xf32>
    %162 = vector.broadcast %140 : vector<1x32xf32> to vector<8x32xf32>
    %163 = arith.mulf %161, %162 : vector<8x32xf32>
    %164 = vector.broadcast %141 : vector<1x32xf32> to vector<8x32xf32>
    %165 = arith.addf %163, %164 : vector<8x32xf32>
    %c0_69 = arith.constant 0 : index
    %c0_70 = arith.constant 0 : index
    %166 = vector.load %arg17[%c0_69, %c0_70] : memref<8x32xf32, #tpu.memory_space<vmem>>, vector<8x32xf32>
    tpu.vector_store %arg17[%c0_69, %c0_70], %165 {strides = array<i32>} : memref<8x32xf32, #tpu.memory_space<vmem>>, vector<8x32xf32>,
    return
  }
  func.func @transform_0(%arg0: i32) -> (i32, i32) {
    %c0_i32 = arith.constant 0 : i32
    %c0_i32_0 = arith.constant 0 : i32
    return %arg0, %c0_i32 : i32, i32
  }
  func.func @transform_1(%arg0: i32) -> (i32, i32) {
    %c0_i32 = arith.constant 0 : i32
    %c0_i32_0 = arith.constant 0 : i32
    return %arg0, %c0_i32 : i32, i32
  }
  func.func @transform_2(%arg0: i32) -> (i32, i32) {
    %c0_i32 = arith.constant 0 : i32
    %c0_i32_0 = arith.constant 0 : i32
    %c0_i32_1 = arith.constant 0 : i32
    return %c0_i32, %c0_i32_0 : i32, i32
  }
  func.func @transform_3(%arg0: i32) -> (i32, i32) {
    %c0_i32 = arith.constant 0 : i32
    %c0_i32_0 = arith.constant 0 : i32
    %c0_i32_1 = arith.constant 0 : i32
    return %c0_i32, %c0_i32_0 : i32, i32
  }
  func.func @transform_4(%arg0: i32) -> (i32, i32) {
    %c0_i32 = arith.constant 0 : i32
    %c0_i32_0 = arith.constant 0 : i32
    %c0_i32_1 = arith.constant 0 : i32
    return %c0_i32, %c0_i32_0 : i32, i32
  }
  func.func @transform_5(%arg0: i32) -> (i32, i32) {
    %c0_i32 = arith.constant 0 : i32
    %c0_i32_0 = arith.constant 0 : i32
    %c0_i32_1 = arith.constant 0 : i32
    return %c0_i32, %c0_i32_0 : i32, i32
  }
  func.func @transform_6(%arg0: i32) -> (i32, i32) {
    %c0_i32 = arith.constant 0 : i32
    %c0_i32_0 = arith.constant 0 : i32
    %c0_i32_1 = arith.constant 0 : i32
    return %c0_i32, %c0_i32_0 : i32, i32
  }
  func.func @transform_7(%arg0: i32) -> (i32, i32) {
    %c0_i32 = arith.constant 0 : i32
    %c0_i32_0 = arith.constant 0 : i32
    %c0_i32_1 = arith.constant 0 : i32
    return %c0_i32, %c0_i32_0 : i32, i32
  }
  func.func @transform_8(%arg0: i32) -> (i32, i32) {
    %c0_i32 = arith.constant 0 : i32
    %c0_i32_0 = arith.constant 0 : i32
    %c0_i32_1 = arith.constant 0 : i32
    return %c0_i32, %c0_i32_0 : i32, i32
  }
  func.func @transform_9(%arg0: i32) -> (i32, i32) {
    %c0_i32 = arith.constant 0 : i32
    %c0_i32_0 = arith.constant 0 : i32
    %c0_i32_1 = arith.constant 0 : i32
    return %c0_i32, %c0_i32_0 : i32, i32
  }
  func.func @transform_10(%arg0: i32) -> (i32, i32) {
    %c0_i32 = arith.constant 0 : i32
    %c0_i32_0 = arith.constant 0 : i32
    %c0_i32_1 = arith.constant 0 : i32
    return %c0_i32, %c0_i32_0 : i32, i32
  }
  func.func @transform_11(%arg0: i32) -> (i32, i32) {
    %c0_i32 = arith.constant 0 : i32
    %c0_i32_0 = arith.constant 0 : i32
    %c0_i32_1 = arith.constant 0 : i32
    return %c0_i32, %c0_i32_0 : i32, i32
  }
  func.func @transform_12(%arg0: i32) -> (i32, i32) {
    %c0_i32 = arith.constant 0 : i32
    %c0_i32_0 = arith.constant 0 : i32
    %c0_i32_1 = arith.constant 0 : i32
    return %c0_i32, %c0_i32_0 : i32, i32
  }
  func.func @transform_13(%arg0: i32) -> (i32, i32) {
    %c0_i32 = arith.constant 0 : i32
    %c0_i32_0 = arith.constant 0 : i32
    %c0_i32_1 = arith.constant 0 : i32
    return %c0_i32, %c0_i32_0 : i32, i32
  }
  func.func @transform_14(%arg0: i32) -> (i32, i32) {
    %c0_i32 = arith.constant 0 : i32
    %c0_i32_0 = arith.constant 0 : i32
    %c0_i32_1 = arith.constant 0 : i32
    return %c0_i32, %c0_i32_0 : i32, i32
  }
  func.func @transform_15(%arg0: i32) -> (i32, i32) {
    %c0_i32 = arith.constant 0 : i32
    %c0_i32_0 = arith.constant 0 : i32
    %c0_i32_1 = arith.constant 0 : i32
    return %c0_i32, %c0_i32_0 : i32, i32
  }
  func.func @transform_16(%arg0: i32) -> (i32, i32) {
    %c0_i32 = arith.constant 0 : i32
    %c0_i32_0 = arith.constant 0 : i32
    return %arg0, %c0_i32 : i32, i32
  }
}

module attributes {stable_mosaic.version = 11 : i64} {
  func.func @fusion_kernel(%arg0: i32, %arg1: memref<8x32xf32, #tpu.memory_space<vmem>>, %arg2: memref<8x32xf32, #tpu.memory_space<vmem>>, %arg3: memref<32x32xf32, #tpu.memory_space<vmem>>, %arg4: memref<32x64xf32, #tpu.memory_space<vmem>>, %arg5: memref<1x32xf32, #tpu.memory_space<vmem>>, %arg6: memref<1x64xf32, #tpu.memory_space<vmem>>, %arg7: memref<32x32xf32, #tpu.memory_space<vmem>>, %arg8: memref<32x64xf32, #tpu.memory_space<vmem>>, %arg9: memref<32x64xf32, #tpu.memory_space<vmem>>, %arg10: memref<1x64xf32, #tpu.memory_space<vmem>>, %arg11: memref<1x64xf32, #tpu.memory_space<vmem>>, %arg12: memref<1x64xf32, #tpu.memory_space<vmem>>, %arg13: memref<64x32xf32, #tpu.memory_space<vmem>>, %arg14: memref<1x32xf32, #tpu.memory_space<vmem>>, %arg15: memref<1x32xf32, #tpu.memory_space<vmem>>, %arg16: memref<1x32xf32, #tpu.memory_space<vmem>>, %arg17: memref<8x32xf32, #tpu.memory_space<vmem>>) attributes {dimension_semantics = [#tpu.dimension_semantics<parallel>], iteration_bounds = array<i64: 2>, scalar_prefetch = 0 : i64, scratch_operands = 0 : i64, tpu.core_type = #tpu.core_type<tc>, window_params = [{transform_indices = @transform_0, window_bounds = array<i64: 8, 32>}, {transform_indices = @transform_1, window_bounds = array<i64: 8, 32>}, {pipeline_mode = #tpu.pipeline_mode<synchronous>, transform_indices = @transform_2, window_bounds = array<i64: 32, 32>}, {pipeline_mode = #tpu.pipeline_mode<synchronous>, transform_indices = @transform_3, window_bounds = array<i64: 32, 64>}, {pipeline_mode = #tpu.pipeline_mode<synchronous>, transform_indices = @transform_4, window_bounds = array<i64: 1, 32>}, {pipeline_mode = #tpu.pipeline_mode<synchronous>, transform_indices = @transform_5, window_bounds = array<i64: 1, 64>}, {pipeline_mode = #tpu.pipeline_mode<synchronous>, transform_indices = @transform_6, window_bounds = array<i64: 32, 32>}, {pipeline_mode = #tpu.pipeline_mode<synchronous>, transform_indices = @transform_7, window_bounds = array<i64: 32, 64>}, {pipeline_mode = #tpu.pipeline_mode<synchronous>, transform_indices = @transform_8, window_bounds = array<i64: 32, 64>}, {pipeline_mode = #tpu.pipeline_mode<synchronous>, transform_indices = @transform_9, window_bounds = array<i64: 1, 64>}, {pipeline_mode = #tpu.pipeline_mode<synchronous>, transform_indices = @transform_10, window_bounds = array<i64: 1, 64>}, {pipeline_mode = #tpu.pipeline_mode<synchronous>, transform_indices = @transform_11, window_bounds = array<i64: 1, 64>}, {pipeline_mode = #tpu.pipeline_mode<synchronous>, transform_indices = @transform_12, window_bounds = array<i64: 64, 32>}, {pipeline_mode = #tpu.pipeline_mode<synchronous>, transform_indices = @transform_13, window_bounds = array<i64: 1, 32>}, {pipeline_mode = #tpu.pipeline_mode<synchronous>, transform_indices = @transform_14, window_bounds = array<i64: 1, 32>}, {pipeline_mode = #tpu.pipeline_mode<synchronous>, transform_indices = @transform_15, window_bounds = array<i64: 1, 32>}, {transform_indices = @transform_16, window_bounds = array<i64: 8, 32>}]} {
    %c0 = arith.constant 0 : index
    %c0_0 = arith.constant 0 : index
    %0 = vector.load %arg1[%c0, %c0_0] : memref<8x32xf32, #tpu.memory_space<vmem>>, vector<8x32xf32>
    %c0_1 = arith.constant 0 : index
    %c0_2 = arith.constant 0 : index
    %1 = vector.load %arg2[%c0_1, %c0_2] : memref<8x32xf32, #tpu.memory_space<vmem>>, vector<8x32xf32>
    %c0_3 = arith.constant 0 : index
    %c0_4 = arith.constant 0 : index
    %2 = vector.load %arg3[%c0_3, %c0_4] : memref<32x32xf32, #tpu.memory_space<vmem>>, vector<32x32xf32>
    %cst = arith.constant dense<0.000000e+00> : vector<8x32xf32>
    %3 = tpu.matmul %0, %2, %cst {dimension_numbers = #tpu.dot_dimension_numbers<[1], [0], [0], [1], [0, 0, 1, 1], [], []>} : vector<8x32xf32>, vector<32x32xf32>, vector<8x32xf32> -> vector<8x32xf32>
    %c0_5 = arith.constant 0 : index
    %c0_6 = arith.constant 0 : index
    %4 = vector.load %arg5[%c0_5, %c0_6] : memref<1x32xf32, #tpu.memory_space<vmem>>, vector<1x32xf32>
    %5 = vector.broadcast %4 : vector<1x32xf32> to vector<8x32xf32>
    %6 = arith.addf %3, %5 : vector<8x32xf32>
    %c0_7 = arith.constant 0 : index
    %c0_8 = arith.constant 0 : index
    %7 = vector.load %arg4[%c0_7, %c0_8] : memref<32x64xf32, #tpu.memory_space<vmem>>, vector<32x64xf32>
    %cst_9 = arith.constant dense<0.000000e+00> : vector<8x64xf32>
    %8 = tpu.matmul %1, %7, %cst_9 {dimension_numbers = #tpu.dot_dimension_numbers<[1], [0], [0], [1], [0, 0, 1, 1], [], []>} : vector<8x32xf32>, vector<32x64xf32>, vector<8x64xf32> -> vector<8x64xf32>
    %c0_10 = arith.constant 0 : index
    %c0_11 = arith.constant 0 : index
    %9 = vector.load %arg6[%c0_10, %c0_11] : memref<1x64xf32, #tpu.memory_space<vmem>>, vector<1x64xf32>
    %10 = vector.broadcast %9 : vector<1x64xf32> to vector<8x64xf32>
    %11 = arith.addf %8, %10 : vector<8x64xf32>
    %12 = vector.extract_strided_slice %6 {offsets = [0, 0], sizes = [8, 8], strides = [1, 1]} : vector<8x32xf32> to vector<8x8xf32>
    %13 = vector.shape_cast %12 : vector<8x8xf32> to vector<1x8x8xf32>
    %14 = vector.extract_strided_slice %11 {offsets = [0, 0], sizes = [8, 8], strides = [1, 1]} : vector<8x64xf32> to vector<8x8xf32>
    %15 = vector.shape_cast %14 : vector<8x8xf32> to vector<1x8x8xf32>
    %16 = vector.extract_strided_slice %11 {offsets = [0, 32], sizes = [8, 8], strides = [1, 1]} : vector<8x64xf32> to vector<8x8xf32>
    %17 = vector.shape_cast %16 : vector<8x8xf32> to vector<1x8x8xf32>
    "tpu.trace_start"() <{level = 10 : i32, message = "bqe,bke->bqk"}> : () -> ()
    %cst_12 = arith.constant dense<0.000000e+00> : vector<1x8x8xf32>
    %18 = tpu.matmul %13, %15, %cst_12 {dimension_numbers = #tpu.dot_dimension_numbers<[2], [2], [1], [1], [0, 0, 0, 1, 1, 1], [0], [0]>} : vector<1x8x8xf32>, vector<1x8x8xf32>, vector<1x8x8xf32> -> vector<1x8x8xf32>
    "tpu.trace_stop"() : () -> ()
    %cst_13 = arith.constant 0.353553385 : f32
    %19 = vector.broadcast %cst_13 : f32 to vector<1x8x8xf32>
    %20 = arith.mulf %18, %19 : vector<1x8x8xf32>
    %cst_14 = arith.constant dense<0xFF800000> : vector<1x8xf32>
    %21 = vector.multi_reduction <maximumf>, %20, %cst_14 [2] : vector<1x8x8xf32> to vector<1x8xf32>
    %22 = vector.shape_cast %21 : vector<1x8xf32> to vector<1x8x1xf32>
    %23 = vector.broadcast %22 : vector<1x8x1xf32> to vector<1x8x8xf32>
    %24 = arith.subf %20, %23 : vector<1x8x8xf32>
    %25 = math.exp %24 : vector<1x8x8xf32>
    %cst_15 = arith.constant dense<0.000000e+00> : vector<1x8xf32>
    %26 = vector.multi_reduction <add>, %25, %cst_15 [2] : vector<1x8x8xf32> to vector<1x8xf32>
    %27 = vector.shape_cast %26 : vector<1x8xf32> to vector<1x8x1xf32>
    "tpu.trace_start"() <{level = 10 : i32, message = "bqk,bke->bqe"}> : () -> ()
    %cst_16 = arith.constant dense<0.000000e+00> : vector<1x8x8xf32>
    %28 = tpu.matmul %25, %17, %cst_16 {dimension_numbers = #tpu.dot_dimension_numbers<[2], [1], [1], [2], [0, 0, 0, 1, 1, 2], [0], [0]>} : vector<1x8x8xf32>, vector<1x8x8xf32>, vector<1x8x8xf32> -> vector<1x8x8xf32>
    "tpu.trace_stop"() : () -> ()
    %29 = tpu.reciprocal %27 {approx = true} : vector<1x8x1xf32> -> vector<1x8x1xf32>
    %30 = vector.broadcast %29 : vector<1x8x1xf32> to vector<1x8x8xf32>
    %31 = arith.mulf %28, %30 : vector<1x8x8xf32>
    %32 = vector.shape_cast %31 : vector<1x8x8xf32> to vector<8x8xf32>
    %33 = vector.extract_strided_slice %6 {offsets = [0, 8], sizes = [8, 8], strides = [1, 1]} : vector<8x32xf32> to vector<8x8xf32>
    %34 = vector.shape_cast %33 : vector<8x8xf32> to vector<1x8x8xf32>
    %35 = vector.extract_strided_slice %11 {offsets = [0, 8], sizes = [8, 8], strides = [1, 1]} : vector<8x64xf32> to vector<8x8xf32>
    %36 = vector.shape_cast %35 : vector<8x8xf32> to vector<1x8x8xf32>
    %37 = vector.extract_strided_slice %11 {offsets = [0, 40], sizes = [8, 8], strides = [1, 1]} : vector<8x64xf32> to vector<8x8xf32>
    %38 = vector.shape_cast %37 : vector<8x8xf32> to vector<1x8x8xf32>
    "tpu.trace_start"() <{level = 10 : i32, message = "bqe,bke->bqk"}> : () -> ()
    %cst_17 = arith.constant dense<0.000000e+00> : vector<1x8x8xf32>
    %39 = tpu.matmul %34, %36, %cst_17 {dimension_numbers = #tpu.dot_dimension_numbers<[2], [2], [1], [1], [0, 0, 0, 1, 1, 1], [0], [0]>} : vector<1x8x8xf32>, vector<1x8x8xf32>, vector<1x8x8xf32> -> vector<1x8x8xf32>
    "tpu.trace_stop"() : () -> ()
    %cst_18 = arith.constant 0.353553385 : f32
    %40 = vector.broadcast %cst_18 : f32 to vector<1x8x8xf32>
    %41 = arith.mulf %39, %40 : vector<1x8x8xf32>
    %cst_19 = arith.constant dense<0xFF800000> : vector<1x8xf32>
    %42 = vector.multi_reduction <maximumf>, %41, %cst_19 [2] : vector<1x8x8xf32> to vector<1x8xf32>
    %43 = vector.shape_cast %42 : vector<1x8xf32> to vector<1x8x1xf32>
    %44 = vector.broadcast %43 : vector<1x8x1xf32> to vector<1x8x8xf32>
    %45 = arith.subf %41, %44 : vector<1x8x8xf32>
    %46 = math.exp %45 : vector<1x8x8xf32>
    %cst_20 = arith.constant dense<0.000000e+00> : vector<1x8xf32>
    %47 = vector.multi_reduction <add>, %46, %cst_20 [2] : vector<1x8x8xf32> to vector<1x8xf32>
    %48 = vector.shape_cast %47 : vector<1x8xf32> to vector<1x8x1xf32>
    "tpu.trace_start"() <{level = 10 : i32, message = "bqk,bke->bqe"}> : () -> ()
    %cst_21 = arith.constant dense<0.000000e+00> : vector<1x8x8xf32>
    %49 = tpu.matmul %46, %38, %cst_21 {dimension_numbers = #tpu.dot_dimension_numbers<[2], [1], [1], [2], [0, 0, 0, 1, 1, 2], [0], [0]>} : vector<1x8x8xf32>, vector<1x8x8xf32>, vector<1x8x8xf32> -> vector<1x8x8xf32>
    "tpu.trace_stop"() : () -> ()
    %50 = tpu.reciprocal %48 {approx = true} : vector<1x8x1xf32> -> vector<1x8x1xf32>
    %51 = vector.broadcast %50 : vector<1x8x1xf32> to vector<1x8x8xf32>
    %52 = arith.mulf %49, %51 : vector<1x8x8xf32>
    %53 = vector.shape_cast %52 : vector<1x8x8xf32> to vector<8x8xf32>
    %54 = vector.extract_strided_slice %6 {offsets = [0, 16], sizes = [8, 8], strides = [1, 1]} : vector<8x32xf32> to vector<8x8xf32>
    %55 = vector.shape_cast %54 : vector<8x8xf32> to vector<1x8x8xf32>
    %56 = vector.extract_strided_slice %11 {offsets = [0, 16], sizes = [8, 8], strides = [1, 1]} : vector<8x64xf32> to vector<8x8xf32>
    %57 = vector.shape_cast %56 : vector<8x8xf32> to vector<1x8x8xf32>
    %58 = vector.extract_strided_slice %11 {offsets = [0, 48], sizes = [8, 8], strides = [1, 1]} : vector<8x64xf32> to vector<8x8xf32>
    %59 = vector.shape_cast %58 : vector<8x8xf32> to vector<1x8x8xf32>
    "tpu.trace_start"() <{level = 10 : i32, message = "bqe,bke->bqk"}> : () -> ()
    %cst_22 = arith.constant dense<0.000000e+00> : vector<1x8x8xf32>
    %60 = tpu.matmul %55, %57, %cst_22 {dimension_numbers = #tpu.dot_dimension_numbers<[2], [2], [1], [1], [0, 0, 0, 1, 1, 1], [0], [0]>} : vector<1x8x8xf32>, vector<1x8x8xf32>, vector<1x8x8xf32> -> vector<1x8x8xf32>
    "tpu.trace_stop"() : () -> ()
    %cst_23 = arith.constant 0.353553385 : f32
    %61 = vector.broadcast %cst_23 : f32 to vector<1x8x8xf32>
    %62 = arith.mulf %60, %61 : vector<1x8x8xf32>
    %cst_24 = arith.constant dense<0xFF800000> : vector<1x8xf32>
    %63 = vector.multi_reduction <maximumf>, %62, %cst_24 [2] : vector<1x8x8xf32> to vector<1x8xf32>
    %64 = vector.shape_cast %63 : vector<1x8xf32> to vector<1x8x1xf32>
    %65 = vector.broadcast %64 : vector<1x8x1xf32> to vector<1x8x8xf32>
    %66 = arith.subf %62, %65 : vector<1x8x8xf32>
    %67 = math.exp %66 : vector<1x8x8xf32>
    %cst_25 = arith.constant dense<0.000000e+00> : vector<1x8xf32>
    %68 = vector.multi_reduction <add>, %67, %cst_25 [2] : vector<1x8x8xf32> to vector<1x8xf32>
    %69 = vector.shape_cast %68 : vector<1x8xf32> to vector<1x8x1xf32>
    "tpu.trace_start"() <{level = 10 : i32, message = "bqk,bke->bqe"}> : () -> ()
    %cst_26 = arith.constant dense<0.000000e+00> : vector<1x8x8xf32>
    %70 = tpu.matmul %67, %59, %cst_26 {dimension_numbers = #tpu.dot_dimension_numbers<[2], [1], [1], [2], [0, 0, 0, 1, 1, 2], [0], [0]>} : vector<1x8x8xf32>, vector<1x8x8xf32>, vector<1x8x8xf32> -> vector<1x8x8xf32>
    "tpu.trace_stop"() : () -> ()
    %71 = tpu.reciprocal %69 {approx = true} : vector<1x8x1xf32> -> vector<1x8x1xf32>
    %72 = vector.broadcast %71 : vector<1x8x1xf32> to vector<1x8x8xf32>
    %73 = arith.mulf %70, %72 : vector<1x8x8xf32>
    %74 = vector.shape_cast %73 : vector<1x8x8xf32> to vector<8x8xf32>
    %75 = vector.extract_strided_slice %6 {offsets = [0, 24], sizes = [8, 8], strides = [1, 1]} : vector<8x32xf32> to vector<8x8xf32>
    %76 = vector.shape_cast %75 : vector<8x8xf32> to vector<1x8x8xf32>
    %77 = vector.extract_strided_slice %11 {offsets = [0, 24], sizes = [8, 8], strides = [1, 1]} : vector<8x64xf32> to vector<8x8xf32>
    %78 = vector.shape_cast %77 : vector<8x8xf32> to vector<1x8x8xf32>
    %79 = vector.extract_strided_slice %11 {offsets = [0, 56], sizes = [8, 8], strides = [1, 1]} : vector<8x64xf32> to vector<8x8xf32>
    %80 = vector.shape_cast %79 : vector<8x8xf32> to vector<1x8x8xf32>
    "tpu.trace_start"() <{level = 10 : i32, message = "bqe,bke->bqk"}> : () -> ()
    %cst_27 = arith.constant dense<0.000000e+00> : vector<1x8x8xf32>
    %81 = tpu.matmul %76, %78, %cst_27 {dimension_numbers = #tpu.dot_dimension_numbers<[2], [2], [1], [1], [0, 0, 0, 1, 1, 1], [0], [0]>} : vector<1x8x8xf32>, vector<1x8x8xf32>, vector<1x8x8xf32> -> vector<1x8x8xf32>
    "tpu.trace_stop"() : () -> ()
    %cst_28 = arith.constant 0.353553385 : f32
    %82 = vector.broadcast %cst_28 : f32 to vector<1x8x8xf32>
    %83 = arith.mulf %81, %82 : vector<1x8x8xf32>
    %cst_29 = arith.constant dense<0xFF800000> : vector<1x8xf32>
    %84 = vector.multi_reduction <maximumf>, %83, %cst_29 [2] : vector<1x8x8xf32> to vector<1x8xf32>
    %85 = vector.shape_cast %84 : vector<1x8xf32> to vector<1x8x1xf32>
    %86 = vector.broadcast %85 : vector<1x8x1xf32> to vector<1x8x8xf32>
    %87 = arith.subf %83, %86 : vector<1x8x8xf32>
    %88 = math.exp %87 : vector<1x8x8xf32>
    %cst_30 = arith.constant dense<0.000000e+00> : vector<1x8xf32>
    %89 = vector.multi_reduction <add>, %88, %cst_30 [2] : vector<1x8x8xf32> to vector<1x8xf32>
    %90 = vector.shape_cast %89 : vector<1x8xf32> to vector<1x8x1xf32>
    "tpu.trace_start"() <{level = 10 : i32, message = "bqk,bke->bqe"}> : () -> ()
    %cst_31 = arith.constant dense<0.000000e+00> : vector<1x8x8xf32>
    %91 = tpu.matmul %88, %80, %cst_31 {dimension_numbers = #tpu.dot_dimension_numbers<[2], [1], [1], [2], [0, 0, 0, 1, 1, 2], [0], [0]>} : vector<1x8x8xf32>, vector<1x8x8xf32>, vector<1x8x8xf32> -> vector<1x8x8xf32>
    "tpu.trace_stop"() : () -> ()
    %92 = tpu.reciprocal %90 {approx = true} : vector<1x8x1xf32> -> vector<1x8x1xf32>
    %93 = vector.broadcast %92 : vector<1x8x1xf32> to vector<1x8x8xf32>
    %94 = arith.mulf %91, %93 : vector<1x8x8xf32>
    %95 = vector.shape_cast %94 : vector<1x8x8xf32> to vector<8x8xf32>
    %96 = tpu.concatenate %32, %53, %74, %95 in 1 : vector<8x8xf32>, vector<8x8xf32>, vector<8x8xf32>, vector<8x8xf32> -> vector<8x32xf32>
    %c0_32 = arith.constant 0 : index
    %c0_33 = arith.constant 0 : index
    %97 = vector.load %arg7[%c0_32, %c0_33] : memref<32x32xf32, #tpu.memory_space<vmem>>, vector<32x32xf32>
    %cst_34 = arith.constant dense<0.000000e+00> : vector<8x32xf32>
    %98 = tpu.matmul %96, %97, %cst_34 {dimension_numbers = #tpu.dot_dimension_numbers<[1], [0], [0], [1], [0, 0, 1, 1], [], []>} : vector<8x32xf32>, vector<32x32xf32>, vector<8x32xf32> -> vector<8x32xf32>
    %c0_35 = arith.constant 0 : index
    %c0_36 = arith.constant 0 : index
    %99 = vector.load %arg8[%c0_35, %c0_36] : memref<32x64xf32, #tpu.memory_space<vmem>>, vector<32x64xf32>
    %cst_37 = arith.constant dense<0.000000e+00> : vector<8x64xf32>
    %100 = tpu.matmul %98, %99, %cst_37 {dimension_numbers = #tpu.dot_dimension_numbers<[1], [0], [0], [1], [0, 0, 1, 1], [], []>} : vector<8x32xf32>, vector<32x64xf32>, vector<8x64xf32> -> vector<8x64xf32>
    %c0_38 = arith.constant 0 : index
    %c0_39 = arith.constant 0 : index
    %101 = vector.load %arg9[%c0_38, %c0_39] : memref<32x64xf32, #tpu.memory_space<vmem>>, vector<32x64xf32>
    %cst_40 = arith.constant dense<0.000000e+00> : vector<8x64xf32>
    %102 = tpu.matmul %1, %101, %cst_40 {dimension_numbers = #tpu.dot_dimension_numbers<[1], [0], [0], [1], [0, 0, 1, 1], [], []>} : vector<8x32xf32>, vector<32x64xf32>, vector<8x64xf32> -> vector<8x64xf32>
    %103 = arith.addf %100, %102 : vector<8x64xf32>
    %c0_41 = arith.constant 0 : index
    %c0_42 = arith.constant 0 : index
    %104 = vector.load %arg10[%c0_41, %c0_42] : memref<1x64xf32, #tpu.memory_space<vmem>>, vector<1x64xf32>
    %105 = vector.broadcast %104 : vector<1x64xf32> to vector<8x64xf32>
    %106 = arith.addf %103, %105 : vector<8x64xf32>
    %c0_43 = arith.constant 0 : index
    %c0_44 = arith.constant 0 : index
    %107 = vector.load %arg11[%c0_43, %c0_44] : memref<1x64xf32, #tpu.memory_space<vmem>>, vector<1x64xf32>
    %c0_45 = arith.constant 0 : index
    %c0_46 = arith.constant 0 : index
    %108 = vector.load %arg12[%c0_45, %c0_46] : memref<1x64xf32, #tpu.memory_space<vmem>>, vector<1x64xf32>
    %cst_47 = arith.constant dense<0.000000e+00> : vector<8xf32>
    %109 = vector.multi_reduction <add>, %106, %cst_47 [1] : vector<8x64xf32> to vector<8xf32>
    %110 = vector.shape_cast %109 : vector<8xf32> to vector<8x1xf32>
    %cst_48 = arith.constant 6.400000e+01 : f32
    %111 = vector.broadcast %cst_48 : f32 to vector<8x1xf32>
    %112 = arith.divf %110, %111 : vector<8x1xf32>
    %113 = arith.mulf %106, %106 : vector<8x64xf32>
    %cst_49 = arith.constant dense<0.000000e+00> : vector<8xf32>
    %114 = vector.multi_reduction <add>, %113, %cst_49 [1] : vector<8x64xf32> to vector<8xf32>
    %115 = vector.shape_cast %114 : vector<8xf32> to vector<8x1xf32>
    %cst_50 = arith.constant 6.400000e+01 : f32
    %116 = vector.broadcast %cst_50 : f32 to vector<8x1xf32>
    %117 = arith.divf %115, %116 : vector<8x1xf32>
    %118 = arith.mulf %112, %112 : vector<8x1xf32>
    %119 = arith.subf %117, %118 : vector<8x1xf32>
    %cst_51 = arith.constant 0.000000e+00 : f32
    %120 = vector.broadcast %cst_51 : f32 to vector<8x1xf32>
    %121 = arith.maximumf %119, %120 : vector<8x1xf32>
    %122 = vector.broadcast %112 : vector<8x1xf32> to vector<8x64xf32>
    %123 = arith.subf %106, %122 : vector<8x64xf32>
    %cst_52 = arith.constant 9.99999974E-6 : f32
    %124 = vector.broadcast %cst_52 : f32 to vector<8x1xf32>
    %125 = arith.addf %121, %124 : vector<8x1xf32>
    %126 = math.rsqrt %125 : vector<8x1xf32>
    %127 = vector.broadcast %126 : vector<8x1xf32> to vector<8x64xf32>
    %128 = arith.mulf %123, %127 : vector<8x64xf32>
    %129 = vector.broadcast %107 : vector<1x64xf32> to vector<8x64xf32>
    %130 = arith.mulf %128, %129 : vector<8x64xf32>
    %131 = vector.broadcast %108 : vector<1x64xf32> to vector<8x64xf32>
    %132 = arith.addf %130, %131 : vector<8x64xf32>
    %cst_53 = arith.constant 0.000000e+00 : f32
    %133 = vector.broadcast %cst_53 : f32 to vector<8x64xf32>
    %134 = arith.maximumf %132, %133 : vector<8x64xf32>
    %c0_54 = arith.constant 0 : index
    %c0_55 = arith.constant 0 : index
    %135 = vector.load %arg13[%c0_54, %c0_55] : memref<64x32xf32, #tpu.memory_space<vmem>>, vector<64x32xf32>
    %cst_56 = arith.constant dense<0.000000e+00> : vector<8x32xf32>
    %136 = tpu.matmul %134, %135, %cst_56 {dimension_numbers = #tpu.dot_dimension_numbers<[1], [0], [0], [1], [0, 0, 1, 1], [], []>} : vector<8x64xf32>, vector<64x32xf32>, vector<8x32xf32> -> vector<8x32xf32>
    %c0_57 = arith.constant 0 : index
    %c0_58 = arith.constant 0 : index
    %137 = vector.load %arg14[%c0_57, %c0_58] : memref<1x32xf32, #tpu.memory_space<vmem>>, vector<1x32xf32>
    %138 = vector.broadcast %137 : vector<1x32xf32> to vector<8x32xf32>
    %139 = arith.addf %136, %138 : vector<8x32xf32>
    %c0_59 = arith.constant 0 : index
    %c0_60 = arith.constant 0 : index
    %140 = vector.load %arg15[%c0_59, %c0_60] : memref<1x32xf32, #tpu.memory_space<vmem>>, vector<1x32xf32>
    %c0_61 = arith.constant 0 : index
    %c0_62 = arith.constant 0 : index
    %141 = vector.load %arg16[%c0_61, %c0_62] : memref<1x32xf32, #tpu.memory_space<vmem>>, vector<1x32xf32>
    %cst_63 = arith.constant dense<0.000000e+00> : vector<8xf32>
    %142 = vector.multi_reduction <add>, %139, %cst_63 [1] : vector<8x32xf32> to vector<8xf32>
    %143 = vector.shape_cast %142 : vector<8xf32> to vector<8x1xf32>
    %cst_64 = arith.constant 3.200000e+01 : f32
    %144 = vector.broadcast %cst_64 : f32 to vector<8x1xf32>
    %145 = arith.divf %143, %144 : vector<8x1xf32>
    %146 = arith.mulf %139, %139 : vector<8x32xf32>
    %cst_65 = arith.constant dense<0.000000e+00> : vector<8xf32>
    %147 = vector.multi_reduction <add>, %146, %cst_65 [1] : vector<8x32xf32> to vector<8xf32>
    %148 = vector.shape_cast %147 : vector<8xf32> to vector<8x1xf32>
    %cst_66 = arith.constant 3.200000e+01 : f32
    %149 = vector.broadcast %cst_66 : f32 to vector<8x1xf32>
    %150 = arith.divf %148, %149 : vector<8x1xf32>
    %151 = arith.mulf %145, %145 : vector<8x1xf32>
    %152 = arith.subf %150, %151 : vector<8x1xf32>
    %cst_67 = arith.constant 0.000000e+00 : f32
    %153 = vector.broadcast %cst_67 : f32 to vector<8x1xf32>
    %154 = arith.maximumf %152, %153 : vector<8x1xf32>
    %155 = vector.broadcast %145 : vector<8x1xf32> to vector<8x32xf32>
    %156 = arith.subf %139, %155 : vector<8x32xf32>
    %cst_68 = arith.constant 9.99999974E-6 : f32
    %157 = vector.broadcast %cst_68 : f32 to vector<8x1xf32>
    %158 = arith.addf %154, %157 : vector<8x1xf32>
    %159 = math.rsqrt %158 : vector<8x1xf32>
    %160 = vector.broadcast %159 : vector<8x1xf32> to vector<8x32xf32>
    %161 = arith.mulf %156, %160 : vector<8x32xf32>
    %162 = vector.broadcast %140 : vector<1x32xf32> to vector<8x32xf32>
    %163 = arith.mulf %161, %162 : vector<8x32xf32>
    %164 = vector.broadcast %141 : vector<1x32xf32> to vector<8x32xf32>
    %165 = arith.addf %163, %164 : vector<8x32xf32>
    %c0_69 = arith.constant 0 : index
    %c0_70 = arith.constant 0 : index
    %166 = vector.load %arg17[%c0_69, %c0_70] : memref<8x32xf32, #tpu.memory_space<vmem>>, vector<8x32xf32>
    tpu.vector_store %arg17[%c0_69, %c0_70], %165 {strides = array<i32>} : memref<8x32xf32, #tpu.memory_space<vmem>>, vector<8x32xf32>,
    return
  }
  func.func @transform_0(%arg0: i32) -> (i32, i32) {
    %c0_i32 = arith.constant 0 : i32
    %c0_i32_0 = arith.constant 0 : i32
    return %arg0, %c0_i32 : i32, i32
  }
  func.func @transform_1(%arg0: i32) -> (i32, i32) {
    %c0_i32 = arith.constant 0 : i32
    %c0_i32_0 = arith.constant 0 : i32
    return %arg0, %c0_i32 : i32, i32
  }
  func.func @transform_2(%arg0: i32) -> (i32, i32) {
    %c0_i32 = arith.constant 0 : i32
    %c0_i32_0 = arith.constant 0 : i32
    %c0_i32_1 = arith.constant 0 : i32
    return %c0_i32, %c0_i32_0 : i32, i32
  }
  func.func @transform_3(%arg0: i32) -> (i32, i32) {
    %c0_i32 = arith.constant 0 : i32
    %c0_i32_0 = arith.constant 0 : i32
    %c0_i32_1 = arith.constant 0 : i32
    return %c0_i32, %c0_i32_0 : i32, i32
  }
  func.func @transform_4(%arg0: i32) -> (i32, i32) {
    %c0_i32 = arith.constant 0 : i32
    %c0_i32_0 = arith.constant 0 : i32
    %c0_i32_1 = arith.constant 0 : i32
    return %c0_i32, %c0_i32_0 : i32, i32
  }
  func.func @transform_5(%arg0: i32) -> (i32, i32) {
    %c0_i32 = arith.constant 0 : i32
    %c0_i32_0 = arith.constant 0 : i32
    %c0_i32_1 = arith.constant 0 : i32
    return %c0_i32, %c0_i32_0 : i32, i32
  }
  func.func @transform_6(%arg0: i32) -> (i32, i32) {
    %c0_i32 = arith.constant 0 : i32
    %c0_i32_0 = arith.constant 0 : i32
    %c0_i32_1 = arith.constant 0 : i32
    return %c0_i32, %c0_i32_0 : i32, i32
  }
  func.func @transform_7(%arg0: i32) -> (i32, i32) {
    %c0_i32 = arith.constant 0 : i32
    %c0_i32_0 = arith.constant 0 : i32
    %c0_i32_1 = arith.constant 0 : i32
    return %c0_i32, %c0_i32_0 : i32, i32
  }
  func.func @transform_8(%arg0: i32) -> (i32, i32) {
    %c0_i32 = arith.constant 0 : i32
    %c0_i32_0 = arith.constant 0 : i32
    %c0_i32_1 = arith.constant 0 : i32
    return %c0_i32, %c0_i32_0 : i32, i32
  }
  func.func @transform_9(%arg0: i32) -> (i32, i32) {
    %c0_i32 = arith.constant 0 : i32
    %c0_i32_0 = arith.constant 0 : i32
    %c0_i32_1 = arith.constant 0 : i32
    return %c0_i32, %c0_i32_0 : i32, i32
  }
  func.func @transform_10(%arg0: i32) -> (i32, i32) {
    %c0_i32 = arith.constant 0 : i32
    %c0_i32_0 = arith.constant 0 : i32
    %c0_i32_1 = arith.constant 0 : i32
    return %c0_i32, %c0_i32_0 : i32, i32
  }
  func.func @transform_11(%arg0: i32) -> (i32, i32) {
    %c0_i32 = arith.constant 0 : i32
    %c0_i32_0 = arith.constant 0 : i32
    %c0_i32_1 = arith.constant 0 : i32
    return %c0_i32, %c0_i32_0 : i32, i32
  }
  func.func @transform_12(%arg0: i32) -> (i32, i32) {
    %c0_i32 = arith.constant 0 : i32
    %c0_i32_0 = arith.constant 0 : i32
    %c0_i32_1 = arith.constant 0 : i32
    return %c0_i32, %c0_i32_0 : i32, i32
  }
  func.func @transform_13(%arg0: i32) -> (i32, i32) {
    %c0_i32 = arith.constant 0 : i32
    %c0_i32_0 = arith.constant 0 : i32
    %c0_i32_1 = arith.constant 0 : i32
    return %c0_i32, %c0_i32_0 : i32, i32
  }
  func.func @transform_14(%arg0: i32) -> (i32, i32) {
    %c0_i32 = arith.constant 0 : i32
    %c0_i32_0 = arith.constant 0 : i32
    %c0_i32_1 = arith.constant 0 : i32
    return %c0_i32, %c0_i32_0 : i32, i32
  }
  func.func @transform_15(%arg0: i32) -> (i32, i32) {
    %c0_i32 = arith.constant 0 : i32
    %c0_i32_0 = arith.constant 0 : i32
    %c0_i32_1 = arith.constant 0 : i32
    return %c0_i32, %c0_i32_0 : i32, i32
  }
  func.func @transform_16(%arg0: i32) -> (i32, i32) {
    %c0_i32 = arith.constant 0 : i32
    %c0_i32_0 = arith.constant 0 : i32
    return %arg0, %c0_i32 : i32, i32
  }
}

</mosaic_0001>

<bundles_post_ra>
// kernel: tpu_custom_call.1
= control target key start
LH: loop header
LB: loop body
LE: loop exit
PB: predicated region body
PF: predicated region fallthrough
CT: control target
= control target key end

     0   :  { %s3093_s0 = inlined_call_operand.hbm [shape: f32[16,32], index: 0, kind: input, shape index: {}]   ;;  %s3094_s1 = inlined_call_operand.hbm [shape: f32[16,32], index: 1, kind: input, shape index: {}]   ;;  %s3095_s2 = inlined_call_operand.vmem [shape: f32[32,32], index: 2, kind: input, shape index: {}]   ;;  %s3096_s3 = inlined_call_operand.vmem [shape: f32[32,64], index: 3, kind: input, shape index: {}]   ;;  %s3097_s4 = inlined_call_operand.vmem [shape: f32[1,32], index: 4, kind: input, shape index: {}]   ;;  %s3098_s5 = inlined_call_operand.vmem [shape: f32[1,64], index: 5, kind: input, shape index: {}]   ;;  %s3099_s6 = inlined_call_operand.vmem [shape: f32[32,32], index: 6, kind: input, shape index: {}]   ;;  %s3100_s7 = inlined_call_operand.hbm [shape: f32[32,64], index: 7, kind: input, shape index: {}]   ;;  %s3101_s8 = inlined_call_operand.hbm [shape: f32[32,64], index: 8, kind: input, shape index: {}]   ;;  %s3102_s9 = inlined_call_operand.vmem [shape: f32[1,64], index: 9, kind: input, shape index: {}]   ;;  %s3103_s10 = inlined_call_operand.vmem [shape: f32[1,64], index: 10, kind: input, shape index: {}]   ;;  %s3104_s11 = inlined_call_operand.vmem [shape: f32[1,64], index: 11, kind: input, shape index: {}]   ;;  %s3105_s12 = inlined_call_operand.vmem [shape: f32[64,32], index: 12, kind: input, shape index: {}]   ;;  %s3106_s13 = inlined_call_operand.vmem [shape: f32[1,32], index: 13, kind: input, shape index: {}]   ;;  %s3107_s14 = inlined_call_operand.vmem [shape: f32[1,32], index: 14, kind: input, shape index: {}]   ;;  %s3108_s15 = inlined_call_operand.vmem [shape: f32[1,32], index: 15, kind: input, shape index: {}]   ;;  %s3109_s16 = inlined_call_operand.hbm [shape: f32[16,32], index: 16, kind: output, shape index: {}]  }
   0x1   :  { %3123 = sst [smem:[#allocation22_spill]] %s3093_s0 }
   0x2   :  { %3124 = sst [smem:[#allocation23_spill]] %s3100_s7 }
   0x3   :  { %3125 = sst [smem:[#allocation24_spill]] %s3101_s8 }
   0x4   :  { %3126 = sst [smem:[#allocation25_spill]] %s3104_s11 }
   0x5   :  { %3127 = sst [smem:[#allocation26_spill]] %s3106_s13 }
   0x6   :  { %3128 = sst [smem:[#allocation27_spill]] %s3107_s14 }
   0x7   :  { %3129 = sst [smem:[#allocation28_spill]] %s3108_s15 }
   0x8   :  { %3130 = sst [smem:[#allocation29_spill]] %s3109_s16 }
   0x9   :  { %21 = vsyncpa [#allocation3], 0 }
   0xa   :  { %23 = vsyncpa [#allocation3 + $0x1], 0 }
   0xb   :  { %24 = vsyncpa [#allocation6], 0 }
   0xc   :  { %26 = vsyncpa [#allocation6 + $0x1], 0 }
   0xd   :  { %27 = vsyncpa [#allocation9], 0 }
   0xe   :  { %28 = vsyncpa [#allocation4], 0 }
   0xf   :  { %30 = vsyncpa [#allocation4 + $0x1], 0  ;;  %s2632_s21 = smov 0   ;;  %s2634_s22 = smov 0  }
  0x10   :  { %s2636_s23 = smov 0   ;;  %s2638_s24 = smov 0  }
  0x11 LB: > { %3131 = sst [smem:[#allocation16_spill]] %s2513_s21  ;;  %s2653_s25 = sadd.s32 4294967295, %s2525_s24   ;;  %s2525_s24 = sphi %s2638_s24, %s3164_s24   ;;  %s2521_s23 = sphi %s2636_s23, %s3166_s23   ;;  %s2517_s22 = sphi %s2634_s22, %s3168_s22   ;;  %s2513_s21 = sphi %s2632_s21, %s3167_s21  }
  0x12   : > { %3132 = sst [smem:[#allocation17_spill]] %s2521_s23  ;;  %s1973_s26 = sadd.s32 4294967294, %s2525_s24  }
  0x13   : > { %p56_p0 = scmp.ne.s32.totalorder %s2517_s22, %s2513_s21  ;;  %p3114_p1 = scmp.eq.s32.totalorder %s2653_s25, 0 }
  0x14   : > { %p406_p3 = scmp.eq.s32.totalorder %s1973_s26, 1  ;;  %p1974_p5 = scmp.ge.s32.totalorder %s2525_s24, 1 }
  0x15   : > { %p2662_p4 = por %p3114_p1, %p56_p0  ;;  %p413_p7 = scmp.lt.s32.totalorder %s2525_s24, 3 }
  0x16   : > { %p2667_p6 = por %p406_p3, %p56_p0  ;;  %s2527_s30 = smov [#allocation7]  }
  0x17   : > { %s3133_s27 = scalar_select %p2662_p4, 1, 0 }
  0x18   : > { %s3134_s28 = scalar_select %p2667_p6, 1, 0 }
  0x19   : > { %p2672_p8 = pnand %p1974_p5, %p413_p7  ;;  %s440_s0 = sshll.u32 %s2527_s30, 4  ;;  %s2676_s0 = int_to_ptr.vmem [resolvable:$true] %s440_s0 }
  0x1a   : > { %3135 = sst [smem:[#allocation18_spill]] %s3134_s28  ;;  %s2528_s18 = smov [#allocation8]  }
  0x1b   : > { %s3136_s29 = scalar_select %p2672_p8, 1, 0 }
  0x1c   : > { %p2238_p9 = pneg %p2672_p8  ;;  %s453_s19 = sshll.u32 %s2528_s18, 4  ;;  %s2687_s19 = int_to_ptr.vmem [resolvable:$true] %s453_s19 }
  0x1d   : > { %s3138_s7 = sld [smem:[#allocation23_spill]] }
  0x1e   : > { %p2683_p11 = pnand %p2238_p9, %p3114_p1 }
  0x20   : > { %p2333_p13 = pneg %p2683_p11 }
  0x23   : > { %s2331_s30 = scalar_lea.hbm %s3138_s7, 512 }
  0x24   : > { %p2332_p12 = scmp.ne.s32.totalorder %s3138_s7, %s2331_s30  ;;  %p2338_p5 = scmp.lt.u32.totalorder %s2331_s30, %s3138_s7 }
  0x26   : > { %p2334_p0 = pnand %p2333_p13, %p2332_p12 }
  0x28   : > { %p2335_p3 = pneg %p2334_p0 }
  0x2a   : > { %p2340_p7 = pnand %p2338_p5, %p2335_p3 }
  0x2c   : > { %2343 = shalt.err (!%p2340_p7)
}
  0x2d   : > { %s2344_s18 = scalar_lea.vmem %s2676_s0, 512  ;;  %p2352_p2 = scmp.lt.s32.totalorder %s2676_s0, %s2676_s0 }
  0x2e   : > { %p2345_p9 = scmp.ne.s32.totalorder %s2676_s0, %s2344_s18  ;;  %p2353_p12 = scmp.lt.s32.totalorder %s2344_s18, %s2344_s18 }
  0x30   : > { %p2347_p10 = pnand %p2345_p9, %p2333_p13  ;;  %p2354_p0 = por %p2353_p12, %p2352_p2 }
  0x32   : > { %p2348_p1 = pneg %p2347_p10 }
  0x34   : > { %p2355_p6 = pnand %p2354_p0, %p2348_p1 }
  0x36   : > { %2358 = shalt.err (!%p2355_p6)
}
  0x37   : > { %s2529_s15 = smov 128   ;;  %s2530_s16 = smov 8  }
  0x38   : > { %2241 = dma.hbm_to_vmem [thread:$0]  (!%p2683_p11), %s3138_s7, 512, %s2676_s0, [#allocation6], %s2529_s15, %s2529_s15, %s2530_s16  }
  0x39   : > { %s3139_s8 = sld [smem:[#allocation24_spill]] }
  0x3f   : > { %s2359_s30 = scalar_lea.hbm %s3139_s8, 512 }
  0x40   : > { %p2360_p2 = scmp.ne.s32.totalorder %s3139_s8, %s2359_s30  ;;  %p2366_p10 = scmp.lt.u32.totalorder %s2359_s30, %s3139_s8 }
  0x42   : > { %p2362_p1 = pnand %p2360_p2, %p2333_p13 }
  0x44   : > { %p2363_p6 = pneg %p2362_p1 }
  0x46   : > { %p2368_p3 = pnand %p2366_p10, %p2363_p6 }
  0x48   : > { %2371 = shalt.err (!%p2368_p3)
}
  0x49   : > { %s2372_s0 = scalar_lea.vmem %s2687_s19, 512  ;;  %p2380_p12 = scmp.lt.s32.totalorder %s2687_s19, %s2687_s19 }
  0x4a   : > { %p2373_p5 = scmp.ne.s32.totalorder %s2687_s19, %s2372_s0  ;;  %p2381_p0 = scmp.lt.s32.totalorder %s2372_s0, %s2372_s0 }
  0x4c   : > { %p2375_p7 = pnand %p2373_p5, %p2333_p13  ;;  %p2382_p2 = por %p2381_p0, %p2380_p12 }
  0x4e   : > { %p2376_p9 = pneg %p2375_p7 }
  0x50   : > { %p2383_p1 = pnand %p2382_p2, %p2376_p9 }
  0x52   : > { %2386 = shalt.err (!%p2383_p1)
}
  0x53   : > { %2244 = dma.hbm_to_vmem [thread:$0]  (!%p2683_p11), %s3139_s8, 512, %s2687_s19, [#allocation9], %s2529_s15, %s2529_s15, %s2530_s16  }
  0x54   : > { %s2742_s14 = sadd.s32 1, %s2525_s24   ;;  %s43_s17 = sadd.s32 1, %s2521_s23 }
  0x55   : > { %3140 = sst [smem:[#allocation19_spill]] %s2742_s14  ;;  %s40_s21 = ssub.s32 %s2525_s24, %s2742_s14 }
  0x56   : > { %p50_p13 = scmp.ne.s32.totalorder %s2521_s23, %s2517_s22  ;;  %p41_p6 = scmp.eq.s32.totalorder %s40_s21, 0 }
  0x57   : > { %p51_p10 = scmp.eq.s32.totalorder %s2525_s24, 0  ;;  %p3141_p3 = scmp.eq.s32.totalorder %s2653_s25, 1 }
  0x58   : > { %p2258_p7 = scmp.lt.s32.totalorder %s2525_s24, 2  ;;  %s488_s26 = sand.u32 1, %s2521_s23  }
  0x59   : > { %p2752_p5 = por %p3141_p3, %p50_p13  ;;  %p52_p9 = por %p51_p10, %p50_p13 }
  0x5a   : > { %s2758_s20 = scalar_select %p41_p6, %s2521_s23, %s43_s17  }
  0x5b   : > { %s3142_s28 = scalar_select %p2752_p5, 1, 0 }
  0x5c   : > { %3144 = sst [smem:[#allocation21_spill]] %s2758_s20  ;;  %s2761_s19 = sshll.u32 %s488_s26, 3 }
  0x5d   : > { %3143 = sst [smem:[#allocation20_spill]] %s3142_s28  ;;  %s1979_s15 = sshll.u32 %s2525_s24, 7 }
  0x5e   : > { %s3145_s18 = sld [smem:[#allocation22_spill]]  ;;  %s492_s11 = scalar_lea.vmem [#allocation2], %s2761_s19 }
  0x5f   : > { %s499_s13 = sshll.u32 %s492_s11, 4  ;;  %p2772_p11 = pnand %p2258_p7, %p52_p9  ;;  %s2770_s13 = int_to_ptr.vmem [resolvable:$true] %s499_s13 }
  0x60   : > { %s2779_s16 = scalar_lea.hbm %s3094_s1, %s1979_s15  ;;  %s506_s30 = sand.u32 1, %s2525_s24  }
  0x61   : > { %s489_s8 = scalar_lea.sflag [#allocation3], %s488_s26  ;;  %p2389_p0 = pneg %p2772_p11 }
  0x64   : > { %s2767_s0 = scalar_lea.hbm %s3145_s18, %s1979_s15  ;;  %s2392_s14 = scalar_lea.hbm %s3145_s18, 256 }
  0x65   : > { %s2387_s20 = scalar_lea.hbm %s2767_s0, 128  ;;  %p2393_p13 = scmp.lt.u32.totalorder %s2767_s0, %s3145_s18 }
  0x66   : > { %p2388_p12 = scmp.ne.s32.totalorder %s2767_s0, %s2387_s20  ;;  %p2394_p6 = scmp.lt.u32.totalorder %s2392_s14, %s2387_s20 }
  0x67   : > { %p2396_p3 = scmp.lt.u32.totalorder %s2387_s20, %s2767_s0 }
  0x68   : > { %p2390_p2 = pnand %p2389_p0, %p2388_p12  ;;  %p2395_p10 = por %p2394_p6, %p2393_p13 }
  0x6a   : > { %p2391_p1 = pneg %p2390_p2  ;;  %p2397_p7 = por %p2396_p3, %p2395_p10 }
  0x6c   : > { %p2398_p9 = pnand %p2397_p7, %p2391_p1 }
  0x6e   : > { %2401 = shalt.err (!%p2398_p9)
}
  0x6f   : > { %s2402_s26 = scalar_lea.vmem %s2770_s13, 128  ;;  %s2531_s23 = smov [#allocation2]  }
  0x70   : > { %p2403_p12 = scmp.ne.s32.totalorder %s2770_s13, %s2402_s26  ;;  %s2407_s15 = sshll.u32 %s2531_s23, 4  ;;  %s2408_s15 = int_to_ptr.vmem [resolvable:$false] %s2407_s15 }
  0x71   : > { %s2409_s28 = scalar_lea.vmem %s2408_s15, 256  ;;  %p2410_p4 = scmp.lt.s32.totalorder %s2770_s13, %s2408_s15 }
  0x72   : > { %p2405_p2 = pnand %p2403_p12, %p2389_p0  ;;  %p2411_p13 = scmp.lt.s32.totalorder %s2409_s28, %s2402_s26 }
  0x74   : > { %p2406_p5 = pneg %p2405_p2  ;;  %p2412_p6 = por %p2411_p13, %p2410_p4 }
  0x76   : > { %p2413_p10 = pnand %p2412_p6, %p2406_p5 }
  0x78   : > { %2416 = shalt.err (!%p2413_p10)
}
  0x79   : > { %2248 = dma.hbm_to_vmem [thread:$0]  (!%p2772_p11), %s2767_s0, 128, %s2770_s13, %s489_s8  }
  0x7a   : > { %s510_s14 = scalar_lea.vmem [#allocation5], %s2761_s19  ;;  %s507_s21 = scalar_lea.sflag [#allocation6], %s506_s30 }
  0x7b   : > { %s517_s20 = sshll.u32 %s510_s14, 4  ;;  %s2417_s11 = scalar_lea.hbm %s2779_s16, 128  ;;  %s518_s20 = int_to_ptr.vmem [resolvable:$true] %s517_s20 }
  0x7c   : > { %p2418_p4 = scmp.ne.s32.totalorder %s2779_s16, %s2417_s11  ;;  %s2422_s23 = scalar_lea.hbm %s3094_s1, 256 }
  0x7d   : > { %p2423_p3 = scmp.lt.u32.totalorder %s2779_s16, %s3094_s1  ;;  %p2424_p7 = scmp.lt.u32.totalorder %s2422_s23, %s2417_s11 }
  0x7e   : > { %p2420_p5 = pnand %p2418_p4, %p2389_p0  ;;  %p2426_p12 = scmp.lt.u32.totalorder %s2417_s11, %s2779_s16 }
  0x7f   : > { %p2425_p9 = por %p2424_p7, %p2423_p3 }
  0x80   : > { %p2421_p1 = pneg %p2420_p5 }
  0x81   : > { %p2427_p2 = por %p2426_p12, %p2425_p9 }
  0x83   : > { %p2428_p13 = pnand %p2427_p2, %p2421_p1 }
  0x85   : > { %2431 = shalt.err (!%p2428_p13)
}
  0x86   : > { %s2432_s8 = scalar_lea.vmem %s518_s20, 128  ;;  %s2532_s19 = smov [#allocation5]  }
  0x87   : > { %p2433_p6 = scmp.ne.s32.totalorder %s518_s20, %s2432_s8  ;;  %s2437_s0 = sshll.u32 %s2532_s19, 4  ;;  %s2438_s0 = int_to_ptr.vmem [resolvable:$false] %s2437_s0 }
  0x88   : > { %s2439_s13 = scalar_lea.vmem %s2438_s0, 256  ;;  %p2440_p5 = scmp.lt.s32.totalorder %s518_s20, %s2438_s0 }
  0x89   : > { %p2435_p10 = pnand %p2433_p6, %p2389_p0  ;;  %p2441_p8 = scmp.lt.s32.totalorder %s2439_s13, %s2432_s8 }
  0x8b   : > { %p2436_p4 = pneg %p2435_p10  ;;  %p2442_p3 = por %p2441_p8, %p2440_p5 }
  0x8d   : > { %p2443_p7 = pnand %p2442_p3, %p2436_p4 }
  0x8f   : > { %2446 = shalt.err (!%p2443_p7)
}
  0x90   : > { %2251 = dma.hbm_to_vmem [thread:$0]  (!%p2772_p11), %s2779_s16, 128, %s518_s20, %s507_s21  }
  0x91   : > { %p3147_p1 = scmp.ne.s32.totalorder %s3136_s29, 0 }
  0x92   : > { %s2832_s30 = sand.u32 (!%p3147_p1), 1, %s2517_s22   ;;  %p3148_p8 = scmp.ne.s32.totalorder (!%p3147_p1), %s3133_s27, 0 }
  0x93   : > { %526 = sbr.rel (%p3147_p1) target bundleno = 2479 (0x9af), region = 84  ;;  %s2835_s14 = sshll.u32 (!%p3147_p1), %s2832_s30, 3 }
  0x94   : > { %s529_s11 = scalar_lea.sflag (!%p3147_p1), [#allocation3], %s2832_s30  ;;  %s532_s7 = scalar_lea.vmem (!%p3147_p1), [#allocation2], %s2835_s14 }
  0x9a   : > { %2492 = dma.done.wait (%p3148_p8), %s529_s11, 128  }
  0x9b   : > { %2494 = vsyncadd (%p3148_p8), %s529_s11, 4294967168  ;;  %s537_s29 = sand.u32 1, %s2653_s25   ;;  %s541_s16 = scalar_lea.vmem [#allocation5], %s2835_s14 }
  0x9c   : > { %s538_s17 = scalar_lea.sflag [#allocation6], %s537_s29 }
  0x9d   : > { %2496 = dma.done.wait (%p3148_p8), %s538_s17, 128  }
  0x9e   : > { %2498 = vsyncadd (%p3148_p8), %s538_s17, 4294967168  ;;  %p3149_p11 = scmp.eq.s32.totalorder %s2653_s25, 0 }
  0xa0   : > { %2500 = dma.done.wait (%p3149_p11), [#allocation6], 512   ;;  %p3150_p0 = pmov %p3149_p11 }
  0xa2   : > { %2502 = vsyncadd (%p3150_p0), [#allocation6], 4294966784  ;;  %p3151_p9 = pmov %p3150_p0 }
  0xa3   : > { %p3152_p12 = pmov %p3150_p0 }
  0xa4   : > { %2504 = dma.done.wait (%p3151_p9), [#allocation9], 512  }
  0xa5   : > { %2506 = vsyncadd (%p3152_p12), [#allocation9], 4294966784  ;;  %v2533_v0 = vmov 0.0|0.0   ;;  %vm2534_vm0 = vmmov 0   ;;  %v2535_v1 = vmov 0.0   ;;  %v690_v2 = vld [vmem:[%s3096_s3] sm:$0xff] }
  0xa6   : > { %2188 = vmatprep.subr.bf16.mxu1 %v2533_v0  ;;  %2182 = vmatprep.subr.bf16.mxu0 %v2533_v0  ;;  %v691_v3 = vld [vmem:[%s3096_s3 + $0x8] sm:$0xff]  ;;  %v605_v4 = vld [vmem:[%s3095_s2] sm:$0xff]  ;;  %v692_v7 = vld [vmem:[%s3096_s3 + $0x10] sm:$0xff]  ;;  %vm616_vm1 = vcmask 261120   ;;  %vm774_vm2 = vcmask 64512   ;;  %s2536_s23 = smov 120  }
  0xa7   : > { %2087 = vmatprep.mubr.msk.f32.mxu1 %vm2534_vm0, %v2535_v1  ;;  %2076 = vmatprep.mubr.msk.f32.mxu0 %vm2534_vm0, %v2535_v1  ;;  %v2189_v5 = vpack.c.bf16 %v691_v3, %v690_v2  ;;  %v606_v6 = vld [vmem:[%s3095_s2 + $0x8] sm:$0xff]  ;;  %v693_v8 = vld [vmem:[%s3096_s3 + $0x18] sm:$0xff]  ;;  %v607_v10 = vld [vmem:[%s3095_s2 + $0x10] sm:$0xff]  ;;  %s2537_s15 = smov 112   ;;  %s2538_s28 = smov 104   ;;  %vm1450_vm3 = vcmask 130048  }
  0xa8   : > { %v2183_v9 = vpack.c.bf16 %v606_v6, %v605_v4  ;;  %v608_v11 = vld [vmem:[%s3095_s2 + $0x18] sm:$0xff]  ;;  %v2192_v12 = vpack.c.bf16 %v693_v8, %v692_v7  ;;  %v603_v15 = vld [vmem:[%s532_s7] sm:$0xff]  ;;  %s2539_s8 = smov 88   ;;  %s2540_s19 = smov 96   ;;  %vm1452_vm4 = vcmask 195584   ;;  %vm1692_vm5 = vcmask 523264  }
  0xa9   : > { %2190 = vmatpush3.bf16.msra.mxu1 %v2189_v5  ;;  %v2186_v13 = vpack.c.bf16 %v608_v11, %v607_v10  ;;  %v2891_v14 = vld [vmem:[%s541_s16] sm:$0xff]  ;;  %v1990_v16 = vld [vmem:[%s3098_s5] ss:$0 sm:$0xff]  ;;  %s2541_s0 = smov 72   ;;  %s2542_s13 = smov 80  }
  0xaa   : > { %2184 = vmatpush3.bf16.msra.mxu0 %v2183_v9  ;;  %2191 = vmatprep.subr.bf16.mxu1 %v2533_v0  ;;  %v1988_v17 = vld [vmem:[%s3097_s4] ss:$0 sm:$0xff]  ;;  %s2543_s26 = smov 8   ;;  %s3153_s29 = sld [smem:[#allocation25_spill]] }
  0xab   : > { %2185 = vmatprep.subr.bf16.mxu0 %v2533_v0  ;;  %s3154_s20 = sld [smem:[#allocation26_spill]]  ;;  %s3155_s16 = sld [smem:[#allocation20_spill]] }
  0xac   : > { %s1848_s27 = scalar_lea.sflag [#allocation4], %s2832_s30 }
  0xad   : > { %2193 = vmatpush3.bf16.msra.mxu1 %v2192_v12  ;;  %v1454_v12 = vld [vmem:[%s3099_s6] sm:$0xff] }
  0xae   : > { %2187 = vmatpush3.bf16.msra.mxu0 %v2186_v13  ;;  %2105 = vmatprep.subr.mxu1 %v2535_v1  ;;  %v1455_v13 = vld [vmem:[%s3099_s6 + $0x8] sm:$0xff] }
  0xaf   : > { %2090 = vmatprep.subr.mxu0 %v2535_v1 }
  0xb0   : > { %2088 = vmatmul.mubr.msk.f32.vlgmr.msra.gmra.mrb[0].mxu1 %vm616_vm1, %v2891_v14 }
  0xb1   : > { %2077 = vmatmul.mubr.msk.f32.vlgmr.msra.gmra.mrb[0].mxu0 %vm616_vm1, %v603_v15  ;;  %2107 = vmatprep.mubr.msk.f32.mxu1 %vm2534_vm0, %v2535_v1  ;;  %v2195_v15 = vpack.c.bf16 %v1455_v13, %v1454_v12  ;;  %p3159_p13 = scmp.ne.s32.totalorder %s3155_s16, 0 }
  0xb2   : > { %2092 = vmatprep.mubr.msk.f32.mxu0 %vm2534_vm0, %v2535_v1 }
 0x183   : > { %v770_v18 = vpop.f32.mrb[0].mxu1 }
 0x184   : > { %v2910_v19 = vadd.f32 %v1990_v16, %v770_v18  ;;  %v2089_v20 = vpop.f32.mrb[1].mxu1  ;;  %v686_v21 = vpop.f32.mrb[0].mxu0  ;;  %v1456_v16 = vld [vmem:[%s3099_s6 + $0x10] sm:$0xff] }
 0x185   : > { %v687_v22 = vadd.f32 %v1988_v17, %v686_v21  ;;  %v2078_v23 = vpop.f32.mrb[1].mxu0  ;;  %v1457_v17 = vld [vmem:[%s3099_s6 + $0x18] sm:$0xff]  ;;  %v1535_v20 = vld [vmem:[#allocation8] sm:$0xff]  ;;  %v1536_v21 = vld [vmem:[#allocation8 + $0x8] sm:$0xff] }
 0x186   : > { %941 = vrot.lane.b32.xlu1 %v2910_v19, %s2536_s23  ;;  %2091 = vmatpush3.xpose.msk.msra.mxu0 %vm774_vm2, %v2910_v19 }
 0x187   : > { %2095 = vmatprep.subr.mxu0 %v2535_v1 }
 0x189   : > { %2093 = vmatmul.mubr.msk.f32.vlgmr.msra.gmra.mrb[2].mxu0 %vm774_vm2, %v687_v22 }
 0x18a   : > { %939 = vrot.lane.b32.xlu1 %v687_v22, %s2536_s23  ;;  %2097 = vmatprep.mubr.msk.f32.mxu0 %vm2534_vm0, %v2535_v1  ;;  %s2544_s23 = smov 16  }
 0x18e   : > { %1107 = vrot.lane.b32.xlu1 %v2910_v19, %s2537_s15 }
 0x192   : > { %1105 = vrot.lane.b32.xlu1 %v687_v22, %s2537_s15  ;;  %s2545_s15 = smov 24  }
 0x196   : > { %1273 = vrot.lane.b32.xlu1 %v2910_v19, %s2538_s28 }
 0x19a   : > { %1271 = vrot.lane.b32.xlu1 %v687_v22, %s2538_s28  ;;  %s3157_s28 = sld [smem:[#allocation28_spill]] }
 0x19e   : > { %1027 = vrot.lane.b32.xlu1 %v2910_v19, %s2539_s8  ;;  %s2015_s8 = sshll.u32 %s2653_s25, 7  ;;  %s2546_s25 = smov [#allocation10]  }
 0x1f8   : > { %v942_v24 = vpop.permute.xlu1 %941 }
 0x1fc   : > { %v940_v25 = vpop.permute.xlu1 %939 }
 0x200   : > { %v1108_v26 = vpop.permute.xlu1 %1107 }
 0x204   : > { %v1106_v27 = vpop.permute.xlu1 %1105 }
 0x208   : > { %v1274_v28 = vpop.permute.xlu1 %1273 }
 0x20c   : > { %v1272_v29 = vpop.permute.xlu1 %1271 }
 0x210   : > { %v1028_v30 = vpop.permute.xlu1 %1027 }
 0x211   : > { %2106 = vmatpush3.msra.mxu1 %v1028_v30 }
 0x212   : > { %2115 = vmatprep.subr.mxu1 %v2535_v1 }
 0x25c   : > { %v847_v31 = vpop.f32.mrb[2].mxu0 }
 0x25d   : > { %v851_v32 = vmul.f32 0.35355338, %v847_v31  ;;  %v2094_v33 = vpop.f32.mrb[3].mxu0 }
 0x25f   : > { %v852_v34 = vsel %vm774_vm2, %v851_v32, -inf }
 0x260   : > { %853 = vmax.xlane.f32.xlu0 %v852_v34 }
 0x276   : > { %861 = vrot.lane.b32.xlu0 %v2910_v19, %s2540_s19  ;;  %s602_s19 = scalar_lea.vmem [#allocation10], %s2835_s14  ;;  %s2451_s14 = sshll.u32 %s2546_s25, 4  ;;  %s2452_s14 = int_to_ptr.vmem [resolvable:$false] %s2451_s14 }
 0x277   : > { %s2453_s21 = scalar_lea.vmem %s2452_s14, 256 }
 0x2ed   : > { %v854_v35 = vpop.xlane.xlu0 %853 }
 0x2ee   : > { %v855_v36 = vsub.f32 %v851_v32, %v854_v35 }
 0x2f0   : > { %v856_v37 = vmul.f32 1.442695, %v855_v36 }
 0x2f1   : > { %v862_v38 = vpop.permute.xlu0 %861 }
 0x2f2   : > { %2311 = vpow2.f32 %v856_v37  ;;  %2096 = vmatpush3.msra.mxu0 %v862_v38 }
 0x2f3   : > { %2100 = vmatprep.subr.mxu0 %v2535_v1 }
 0x2fc   : > { %v2312_v39 = vpop.eup %2311 }
 0x2fd   : > { %2098 = vmatmul.mubr.msk.f32.vlgmr.msra.gmra.mrb[4].mxu0 %vm774_vm2, %v2312_v39  ;;  %v858_v6 = vsel %vm774_vm2, %v2312_v39, 0.0 }
 0x2fe   : > { %2101 = vmatpush3.xpose.msk.msra.mxu0 %vm774_vm2, %v942_v24  ;;  %2102 = vmatprep.mubr.msk.f32.mxu0 %vm2534_vm0, %v2535_v1  ;;  %v2201_v24 = vpack.c.bf16 %v1536_v21, %v1535_v20 }
 0x2ff   : > { %2110 = vmatprep.subr.mxu0 %v2535_v1 }
 0x301   : > { %2103 = vmatmul.mubr.msk.f32.vlgmr.msra.gmra.mrb[6].mxu0 %vm774_vm2, %v940_v25 }
 0x302   : > { %2111 = vmatpush3.xpose.msk.msra.mxu0 %vm774_vm2, %v1108_v26  ;;  %2112 = vmatprep.mubr.msk.f32.mxu0 %vm2534_vm0, %v2535_v1 }
 0x303   : > { %2120 = vmatprep.subr.mxu0 %v2535_v1 }
 0x305   : > { %2113 = vmatmul.mubr.msk.f32.vlgmr.msra.gmra.mrb[8].mxu0 %vm774_vm2, %v1106_v27  ;;  %v1537_v27 = vld [vmem:[#allocation8 + $0x10] sm:$0xff] }
 0x306   : > { %2121 = vmatpush3.xpose.msk.msra.mxu0 %vm774_vm2, %v1274_v28  ;;  %2122 = vmatprep.mubr.msk.f32.mxu0 %vm2534_vm0, %v2535_v1  ;;  %v1538_v28 = vld [vmem:[#allocation8 + $0x18] sm:$0xff] }
 0x307   : > { %2194 = vmatprep.subr.bf16.mxu0 %v2533_v0 }
 0x309   : > { %2123 = vmatmul.mubr.msk.f32.vlgmr.msra.gmra.mrb[10].mxu0 %vm774_vm2, %v1272_v29  ;;  %v2204_v29 = vpack.c.bf16 %v1538_v28, %v1537_v27 }
 0x30a   : > { %2138 = vmatprep.mubr.msk.f32.mxu0 %vm2534_vm0, %v2535_v1  ;;  %2196 = vmatpush3.bf16.msra.mxu0 %v2195_v15 }
 0x30b   : > { %2197 = vmatprep.subr.bf16.mxu0 %v2533_v0 }
 0x3d0   : > { %v2944_v40 = vpop.f32.mrb[4].mxu0 }
 0x3d1   : > { %v2099_v41 = vpop.f32.mrb[5].mxu0 }
 0x3d4   : > { %v1013_v42 = vpop.f32.mrb[6].mxu0 }
 0x3d5   : > { %v1017_v43 = vmul.f32 0.35355338, %v1013_v42  ;;  %v2104_v44 = vpop.f32.mrb[7].mxu0 }
 0x3d6   : > { %v1532_v44 = vld [vmem:[#allocation7 + $0x8] sm:$0xff] }
 0x3d7   : > { %v1018_v45 = vsel %vm774_vm2, %v1017_v43, -inf }
 0x3d8   : > { %1019 = vmax.xlane.f32.xlu1 %v1018_v45  ;;  %v1179_v46 = vpop.f32.mrb[8].mxu0 }
 0x3d9   : > { %v1183_v47 = vmul.f32 0.35355338, %v1179_v46  ;;  %v2114_v48 = vpop.f32.mrb[9].mxu0 }
 0x3db   : > { %v1184_v49 = vsel %vm774_vm2, %v1183_v47, -inf }
 0x3dc   : > { %1185 = vmax.xlane.f32.xlu0 %v1184_v49  ;;  %v1345_v50 = vpop.f32.mrb[10].mxu0  ;;  %v1533_v49 = vld [vmem:[#allocation7 + $0x10] sm:$0xff] }
 0x3dd   : > { %v1349_v51 = vmul.f32 0.35355338, %v1345_v50  ;;  %v2124_v52 = vpop.f32.mrb[11].mxu0  ;;  %v1534_v50 = vld [vmem:[#allocation7 + $0x18] sm:$0xff] }
 0x3de   : > { %v2210_v52 = vpack.c.bf16 %v1534_v50, %v1533_v49 }
 0x3df   : > { %v1350_v53 = vsel %vm774_vm2, %v1349_v51, -inf }
 0x3e0   : > { %1351 = vmax.xlane.f32.xlu0 %v1350_v53 }
 0x3e9   : > { %1359 = vrot.lane.b32.xlu1 %v2910_v19, %s2541_s0  ;;  %s1861_s0 = sshll.u32 %s602_s19, 4  ;;  %s3050_s0 = int_to_ptr.vmem [resolvable:$true] %s1861_s0 }
 0x3ea   : > { %p2454_p4 = scmp.lt.s32.totalorder %s3050_s0, %s2452_s14 }
 0x3f6   : > { %1193 = vrot.lane.b32.xlu0 %v2910_v19, %s2542_s13  ;;  %v2198_v19 = vpack.c.bf16 %v1457_v17, %v1456_v16 }
 0x3f8   : > { %2199 = vmatpush3.bf16.msra.mxu0 %v2198_v19 }
 0x3f9   : > { %2206 = vmatprep.subr.bf16.mxu0 %v2533_v0 }
 0x465   : > { %v1020_v54 = vpop.xlane.xlu1 %1019 }
 0x466   : > { %v1021_v55 = vsub.f32 %v1017_v43, %v1020_v54  ;;  %v1531_v43 = vld [vmem:[#allocation7] sm:$0xff] }
 0x468   : > { %v1022_v56 = vmul.f32 1.442695, %v1021_v55 }
 0x469   : > { %v1186_v57 = vpop.xlane.xlu0 %1185  ;;  %v1360_v5 = vpop.permute.xlu1 %1359 }
 0x46a   : > { %2313 = vpow2.f32 %v1022_v56  ;;  %v1187_v58 = vsub.f32 %v1183_v47, %v1186_v57  ;;  %v2207_v47 = vpack.c.bf16 %v1532_v44, %v1531_v43  ;;  %v2007_v57 = vld [vmem:[%s3102_s9] ss:$0 sm:$0xff] }
 0x46c   : > { %v1188_v59 = vmul.f32 1.442695, %v1187_v58 }
 0x46d   : > { %v1352_v60 = vpop.xlane.xlu0 %1351 }
 0x46e   : > { %2315 = vpow2.f32 %v1188_v59  ;;  %v1353_v61 = vsub.f32 %v1349_v51, %v1352_v60 }
 0x470   : > { %v1354_v62 = vmul.f32 1.442695, %v1353_v61 }
 0x471   : > { %v1194_v2 = vpop.permute.xlu0 %1193 }
 0x472   : > { %2317 = vpow2.f32 %v1354_v62 }
 0x474   : > { %v2314_v63 = vpop.eup %2313 }
 0x475   : > { %2108 = vmatmul.mubr.msk.f32.vlgmr.msra.gmra.mrb[2].mxu1 %vm774_vm2, %v2314_v63  ;;  %v1024_v3 = vsel %vm774_vm2, %v2314_v63, 0.0  ;;  %v1725_v63 = vld [vmem:[%s3105_s12] sm:$0xff] }
 0x476   : > { %2116 = vmatpush3.msra.mxu1 %v1194_v2  ;;  %1025 = vadd.xlane.f32.xlu1 %v1024_v3  ;;  %v1726_v2 = vld [vmem:[%s3105_s12 + $0x8] sm:$0xff] }
 0x477   : > { %2117 = vmatprep.mubr.msk.f32.mxu1 %vm2534_vm0, %v2535_v1  ;;  %2125 = vmatprep.subr.mxu1 %v2535_v1  ;;  %v2213_v3 = vpack.c.bf16 %v1726_v2, %v1725_v63 }
 0x478   : > { %v2316_v4 = vpop.eup %2315 }
 0x479   : > { %2118 = vmatmul.mubr.msk.f32.vlgmr.msra.gmra.mrb[4].mxu1 %vm774_vm2, %v2316_v4  ;;  %v1190_v7 = vsel %vm774_vm2, %v2316_v4, 0.0  ;;  %v1727_v4 = vld [vmem:[%s3105_s12 + $0x10] sm:$0xff] }
 0x47a   : > { %2126 = vmatpush3.msra.mxu1 %v1360_v5  ;;  %859 = vadd.xlane.f32.xlu1 %v858_v6  ;;  %v1728_v5 = vld [vmem:[%s3105_s12 + $0x18] sm:$0xff] }
 0x47b   : > { %1191 = vadd.xlane.f32.xlu0 %v1190_v7  ;;  %2127 = vmatprep.mubr.msk.f32.mxu1 %vm2534_vm0, %v2535_v1  ;;  %v2216_v6 = vpack.c.bf16 %v1728_v5, %v1727_v4  ;;  %v1729_v7 = vld [vmem:[%s3105_s12 + $0x20] sm:$0xff] }
 0x47c   : > { %v2318_v8 = vpop.eup %2317  ;;  %2200 = vmatprep.subr.bf16.mxu1 %v2533_v0 }
 0x47d   : > { %2128 = vmatmul.mubr.msk.f32.vlgmr.msra.gmra.mrb[6].mxu1 %vm774_vm2, %v2318_v8  ;;  %v1356_v9 = vsel %vm774_vm2, %v2318_v8, 0.0  ;;  %v1730_v8 = vld [vmem:[%s3105_s12 + $0x28] sm:$0xff] }
 0x47e   : > { %2149 = vmatprep.mubr.msk.f32.mxu1 %vm2534_vm0, %v2535_v1  ;;  %2202 = vmatpush3.bf16.msra.mxu1 %v2201_v24  ;;  %v2008_v24 = vld [vmem:[%s3103_s10] ss:$0 sm:$0xff] }
 0x47f   : > { %1357 = vadd.xlane.f32.xlu0 %v1356_v9  ;;  %2203 = vmatprep.subr.bf16.mxu1 %v2533_v0  ;;  %v2219_v9 = vpack.c.bf16 %v1730_v8, %v1729_v7 }
 0x482   : > { %2205 = vmatpush3.bf16.msra.mxu1 %v2204_v29  ;;  %v2010_v29 = vld [vmem:[%s3154_s20] ss:$0 sm:$0xff]  ;;  %s2447_s20 = scalar_lea.vmem %s3050_s0, 128 }
 0x483   : > { %2212 = vmatprep.subr.bf16.mxu1 %v2533_v0  ;;  %p2448_p2 = scmp.ne.s32.totalorder %s3050_s0, %s2447_s20  ;;  %p2455_p5 = scmp.lt.s32.totalorder %s2453_s21, %s2447_s20 }
 0x485   : > { %2150 = vmatmul.mubr.msk.f32.vlgmr.msra.gmra.mrb[8].mxu1 %vm616_vm1, %v2891_v14  ;;  %p2449_p6 = pnand %p2448_p2, %p3159_p13  ;;  %p2456_p3 = por %p2455_p5, %p2454_p4 }
 0x486   : > { %2179 = vmatprep.mubr.msk.f32.mxu1 %vm2534_vm0, %v2535_v1  ;;  %2214 = vmatpush3.bf16.msra.mxu1 %v2213_v3 }
 0x487   : > { %2215 = vmatprep.subr.bf16.mxu1 %v2533_v0  ;;  %p2450_p10 = pneg %p2449_p6 }
 0x489   : > { %p2457_p7 = pnand %p2456_p3, %p2450_p10 }
 0x48a   : > { %2217 = vmatpush3.bf16.msra.mxu1 %v2216_v6 }
 0x48b   : > { %2218 = vmatprep.subr.bf16.mxu1 %v2533_v0 }
 0x48e   : > { %2220 = vmatpush3.bf16.msra.mxu1 %v2219_v9 }
 0x48f   : > { %2221 = vmatprep.subr.bf16.mxu1 %v2533_v0 }
 0x503   : > { %v1026_v10 = vpop.xlane.xlu1 %1025 }
 0x504   : > { %2319 = vrcp.f32 %v1026_v10  ;;  %v1731_v10 = vld [vmem:[%s3105_s12 + $0x30] sm:$0xff] }
 0x507   : > { %v860_v38 = vpop.xlane.xlu1 %859 }
 0x508   : > { %v1192_v11 = vpop.xlane.xlu0 %1191 }
 0x509   : > { %2321 = vrcp.f32 %v1192_v11  ;;  %v1732_v11 = vld [vmem:[%s3105_s12 + $0x38] sm:$0xff] }
 0x50a   : > { %v2222_v12 = vpack.c.bf16 %v1732_v11, %v1731_v10 }
 0x50c   : > { %v1358_v18 = vpop.xlane.xlu0 %1357  ;;  %2223 = vmatpush3.bf16.msra.mxu1 %v2222_v12 }
 0x50d   : > { %2323 = vrcp.f32 %v1358_v18 }
 0x50e   : > { %v2320_v22 = vpop.eup %2319  ;;  %2325 = vrcp.f32 %v860_v38 }
 0x513   : > { %v2322_v30 = vpop.eup %2321 }
 0x517   : > { %v2324_v34 = vpop.eup %2323 }
 0x518   : > { %v2326_v39 = vpop.eup %2325 }
 0x519   : > { %v938_v45 = vmul.f32 %v2326_v39, %v2944_v40 }
 0x548   : > { %v1099_v23 = vpop.f32.mrb[2].mxu1 }
 0x549   : > { %v1104_v25 = vmul.f32 %v2320_v22, %v1099_v23  ;;  %v2109_v26 = vpop.f32.mrb[3].mxu1 }
 0x54b   : > { %1438 = vrot.lane.b32.xlu0 %v1104_v25, %s2543_s26  ;;  %s3156_s26 = sld [smem:[#allocation27_spill]] }
 0x54c   : > { %v1265_v31 = vpop.f32.mrb[4].mxu1 }
 0x54d   : > { %v1270_v32 = vmul.f32 %v2322_v30, %v1265_v31  ;;  %v2119_v33 = vpop.f32.mrb[5].mxu1 }
 0x54f   : > { %1442 = vrot.lane.b32.xlu1 %v1270_v32, %s2544_s23 }
 0x550   : > { %v1431_v35 = vpop.f32.mrb[6].mxu1 }
 0x551   : > { %v1436_v36 = vmul.f32 %v2324_v34, %v1431_v35  ;;  %v2129_v37 = vpop.f32.mrb[7].mxu1 }
 0x553   : > { %1446 = vrot.lane.b32.xlu1 %v1436_v36, %s2545_s15 }
 0x558   : > { %v1605_v40 = vpop.f32.mrb[8].mxu1 }
 0x559   : > { %v2151_v53 = vpop.f32.mrb[9].mxu1 }
 0x5bd   : > { %v1439_v41 = vpop.permute.xlu0 %1438 }
 0x5be   : > { %v1449_v46 = vsel %vm774_vm2, %v938_v45, %v1439_v41 }
 0x5c1   : > { %v1443_v42 = vpop.permute.xlu1 %1442 }
 0x5c2   : > { %v1451_v14 = vsel %vm1450_vm3, %v1449_v46, %v1443_v42 }
 0x5c5   : > { %v1447_v48 = vpop.permute.xlu1 %1446 }
 0x5c6   : > { %v1453_v51 = vsel %vm1452_vm4, %v1451_v14, %v1447_v48  ;;  %v2013_v48 = vld [vmem:[%s3157_s28] ss:$0 sm:$0xff] }
 0x5c7   : > { %2139 = vmatmul.mubr.msk.f32.vlgmr.msra.gmra.mrb[12].mxu0 %vm616_vm1, %v1453_v51 }
 0x5c8   : > { %2208 = vmatpush3.bf16.msra.mxu0 %v2207_v47  ;;  %2160 = vmatprep.mubr.msk.f32.mxu0 %vm2534_vm0, %v2535_v1  ;;  %v2012_v47 = vld [vmem:[%s3156_s26] ss:$0 sm:$0xff] }
 0x5c9   : > { %2209 = vmatprep.subr.bf16.mxu0 %v2533_v0  ;;  %v2009_v0 = vld [vmem:[%s3153_s29] ss:$0 sm:$0xff]  ;;  %s3158_s29 = sld [smem:[#allocation29_spill]] }
 0x5cc   : > { %2211 = vmatpush3.bf16.msra.mxu0 %v2210_v52 }
 0x5cf   : > { %s3048_s17 = scalar_lea.hbm %s3158_s29, %s2015_s8 }
 0x69a   : > { %v1527_v54 = vpop.f32.mrb[12].mxu0 }
 0x69b   : > { %v2140_v55 = vpop.f32.mrb[13].mxu0  ;;  %2161 = vmatmul.mubr.msk.f32.vlgmr.msra.gmra.mrb[14].mxu0 %vm616_vm1, %v1527_v54 }
 0x76e   : > { %v1678_v56 = vpop.f32.mrb[14].mxu0 }
 0x76f   : > { %v1679_v58 = vadd.f32 %v1678_v56, %v1605_v40  ;;  %v2162_v59 = vpop.f32.mrb[15].mxu0 }
 0x771   : > { %v1689_v60 = vadd.f32 %v2007_v57, %v1679_v58 }
 0x773   : > { %v1693_v1 = vsel %vm1692_vm5, %v1689_v60, 0.0  ;;  %v1698_v61 = vmul.f32 %v1689_v60, %v1689_v60 }
 0x774   : > { %1694 = vadd.xlane.f32.xlu0 %v1693_v1 }
 0x775   : > { %v1699_v62 = vsel %vm1692_vm5, %v1698_v61, 0.0 }
 0x776   : > { %1700 = vadd.xlane.f32.xlu1 %v1699_v62 }
 0x801   : > { %v1695_v13 = vpop.xlane.xlu0 %1694 }
 0x802   : > { %v1697_v15 = vmul.f32 0.015625, %v1695_v13 }
 0x803   : > { %v1701_v16 = vpop.xlane.xlu1 %1700 }
 0x804   : > { %v1703_v17 = vmul.f32 %v1697_v15, %v1697_v15  ;;  %v1702_v18 = vmul.f32 0.015625, %v1701_v16  ;;  %v1706_v22 = vsub.f32 %v1689_v60, %v1697_v15 }
 0x806   : > { %v1704_v19 = vsub.f32 %v1702_v18, %v1703_v17 }
 0x808   : > { %v1705_v20 = vmax.f32 %v1704_v19, 0.0 }
 0x80a   : > { %v1707_v21 = vadd.f32 1e-05, %v1705_v20 }
 0x80c   : > { %2327 = vrsqrt.f32 %v1707_v21 }
 0x816   : > { %v2328_v23 = vpop.eup %2327 }
 0x817   : > { %v1709_v25 = vmul.f32 %v2328_v23, %v1706_v22 }
 0x819   : > { %v1716_v26 = vmul.f32 %v2008_v24, %v1709_v25 }
 0x81b   : > { %v1723_v27 = vadd.f32 %v2009_v0, %v1716_v26 }
 0x81d   : > { %v1724_v28 = vmax.f32 %v1723_v27, 0.0 }
 0x81f   : > { %2180 = vmatmul.mubr.msk.f32.vlgmr.msra.gmra.mrb[10].mxu1 %vm1692_vm5, %v1724_v28 }
 0x8f2   : > { %v1809_v30 = vpop.f32.mrb[10].mxu1 }
 0x8f3   : > { %v1810_v31 = vadd.f32 %v2010_v29, %v1809_v30  ;;  %v2181_v32 = vpop.f32.mrb[11].mxu1 }
 0x8f5   : > { %v1815_v33 = vsel %vm616_vm1, %v1810_v31, 0.0  ;;  %v1820_v34 = vmul.f32 %v1810_v31, %v1810_v31 }
 0x8f6   : > { %1816 = vadd.xlane.f32.xlu0 %v1815_v33 }
 0x8f7   : > { %v1821_v35 = vsel %vm616_vm1, %v1820_v34, 0.0 }
 0x8fa   : > { %1822 = vadd.xlane.f32.xlu0 %v1821_v35 }
 0x983   : > { %v1817_v36 = vpop.xlane.xlu0 %1816 }
 0x984   : > { %v1819_v37 = vmul.f32 0.03125, %v1817_v36 }
 0x986   : > { %v1825_v39 = vmul.f32 %v1819_v37, %v1819_v37  ;;  %v1828_v45 = vsub.f32 %v1810_v31, %v1819_v37 }
 0x987   : > { %v1823_v38 = vpop.xlane.xlu0 %1822 }
 0x988   : > { %v1824_v41 = vmul.f32 0.03125, %v1823_v38 }
 0x98a   : > { %v1826_v42 = vsub.f32 %v1824_v41, %v1825_v39 }
 0x98c   : > { %v1827_v43 = vmax.f32 %v1826_v42, 0.0 }
 0x98e   : > { %v1829_v44 = vadd.f32 1e-05, %v1827_v43 }
 0x990   : > { %2329 = vrsqrt.f32 %v1829_v44 }
 0x99a   : > { %v2330_v46 = vpop.eup %2329 }
 0x99b   : > { %v1831_v14 = vmul.f32 %v2330_v46, %v1828_v45 }
 0x99d   : > { %v1838_v49 = vmul.f32 %v2012_v47, %v1831_v14 }
 0x99f   : > { %v1845_v50 = vadd.f32 %v2013_v48, %v1838_v49 }
 0x9a1   : > { %1846 = vst.msk [vmem:[%s602_s19] sm:$0xff] %vm616_vm1, %v1845_v50 }
 0x9a2   : > { %2460 = shalt.err (!%p2457_p7)
}
 0x9a3   : > { %s2461_s30 = scalar_lea.hbm %s3048_s17, 128  ;;  %s2465_s23 = scalar_lea.hbm %s3158_s29, 256 }
 0x9a4   : > { %p2462_p1 = scmp.ne.s32.totalorder %s3048_s17, %s2461_s30  ;;  %p2466_p0 = scmp.lt.u32.totalorder %s3048_s17, %s3158_s29 }
 0x9a5   : > { %p2467_p9 = scmp.lt.u32.totalorder %s2465_s23, %s2461_s30  ;;  %p2469_p2 = scmp.lt.u32.totalorder %s2461_s30, %s3048_s17 }
 0x9a6   : > { %p2463_p8 = pnand %p2462_p1, %p3159_p13 }
 0x9a7   : > { %p2468_p12 = por %p2467_p9, %p2466_p0 }
 0x9a8   : > { %p2464_p11 = pneg %p2463_p8 }
 0x9a9   : > { %p2470_p6 = por %p2469_p2, %p2468_p12 }
 0x9ab   : > { %p2471_p10 = pnand %p2470_p6, %p2464_p11 }
 0x9ad   : > { %2474 = shalt.err (!%p2471_p10)
}
 0x9ae   : > { %2236 = dma.vmem_to_hbm [thread:$0]  (%p3159_p13), %s3050_s0, 128, %s3048_s17, %s1848_s27  }
 0x9af PF: > { %s3160_s8 = sld [smem:[#allocation16_spill]]  ;;  %s3161_s19 = sld [smem:[#allocation18_spill]] }
 0x9b0   : > { %p3163_p5 = scmp.ge.s32.totalorder %s2525_s24, 2 }
 0x9b5   : > { %s1873_s13 = sand.u32 1, %s3160_s8   ;;  %p3162_p4 = scmp.ne.s32.totalorder %s3161_s19, 0 }
 0x9b6   : > { %s1874_s11 = scalar_lea.sflag [#allocation4], %s1873_s13 }
 0x9b7   : > { %p2253_p3 = pnand %p3163_p5, %p3162_p4 }
 0x9b9   : > { %2508 = dma.done.wait (!%p2253_p3), %s1874_s11, 128  }
 0x9ba   : > { %2510 = vsyncadd (!%p2253_p3), %s1874_s11, 4294967168  ;;  %s3164_s24 = sld [smem:[#allocation19_spill]]  ;;  %s3165_s20 = sld [smem:[#allocation17_spill]] }
 0x9bb   : > { %s3166_s23 = sld [smem:[#allocation21_spill]]  ;;  %s3167_s21 = smov %s2517_s22 }
 0x9c0   : > { %p33_p7 = scmp.ge.s32.totalorder %s3164_s24, 4   ;;  %s3168_s22 = smov %s3165_s20 }
 0x9c2   :  { %35 = sbr.rel (!%p33_p7) target bundleno = 17 (0x11), region = 150 }
 0x9c9   :  { %1879 = vsyncpa [#allocation3], 1 }
 0x9ca   :  { %1881 = vsyncpa [#allocation3 + $0x1], 1 }
 0x9cb   :  { %1882 = vsyncpa [#allocation6], 1 }
 0x9cc   :  { %1884 = vsyncpa [#allocation6 + $0x1], 1 }
 0x9cd   :  { %1885 = vsyncpa [#allocation9], 1 }
 0x9ce   :  { %1886 = vsyncpa [#allocation4], 1 }
 0x9cf   :  { %1888 = vsyncpa [#allocation4 + $0x1], 1 }

// kernel: tpu_custom_call.1
= control target key start
LH: loop header
LB: loop body
LE: loop exit
PB: predicated region body
PF: predicated region fallthrough
CT: control target
= control target key end

     0   :  { %s3093_s0 = inlined_call_operand.hbm [shape: f32[16,32], index: 0, kind: input, shape index: {}]   ;;  %s3094_s1 = inlined_call_operand.hbm [shape: f32[16,32], index: 1, kind: input, shape index: {}]   ;;  %s3095_s2 = inlined_call_operand.vmem [shape: f32[32,32], index: 2, kind: input, shape index: {}]   ;;  %s3096_s3 = inlined_call_operand.vmem [shape: f32[32,64], index: 3, kind: input, shape index: {}]   ;;  %s3097_s4 = inlined_call_operand.vmem [shape: f32[1,32], index: 4, kind: input, shape index: {}]   ;;  %s3098_s5 = inlined_call_operand.vmem [shape: f32[1,64], index: 5, kind: input, shape index: {}]   ;;  %s3099_s6 = inlined_call_operand.vmem [shape: f32[32,32], index: 6, kind: input, shape index: {}]   ;;  %s3100_s7 = inlined_call_operand.hbm [shape: f32[32,64], index: 7, kind: input, shape index: {}]   ;;  %s3101_s8 = inlined_call_operand.hbm [shape: f32[32,64], index: 8, kind: input, shape index: {}]   ;;  %s3102_s9 = inlined_call_operand.vmem [shape: f32[1,64], index: 9, kind: input, shape index: {}]   ;;  %s3103_s10 = inlined_call_operand.vmem [shape: f32[1,64], index: 10, kind: input, shape index: {}]   ;;  %s3104_s11 = inlined_call_operand.vmem [shape: f32[1,64], index: 11, kind: input, shape index: {}]   ;;  %s3105_s12 = inlined_call_operand.vmem [shape: f32[64,32], index: 12, kind: input, shape index: {}]   ;;  %s3106_s13 = inlined_call_operand.vmem [shape: f32[1,32], index: 13, kind: input, shape index: {}]   ;;  %s3107_s14 = inlined_call_operand.vmem [shape: f32[1,32], index: 14, kind: input, shape index: {}]   ;;  %s3108_s15 = inlined_call_operand.vmem [shape: f32[1,32], index: 15, kind: input, shape index: {}]   ;;  %s3109_s16 = inlined_call_operand.hbm [shape: f32[16,32], index: 16, kind: output, shape index: {}]  }
   0x1   :  { %3123 = sst [smem:[#allocation22_spill]] %s3093_s0 }
   0x2   :  { %3124 = sst [smem:[#allocation23_spill]] %s3100_s7 }
   0x3   :  { %3125 = sst [smem:[#allocation24_spill]] %s3101_s8 }
   0x4   :  { %3126 = sst [smem:[#allocation25_spill]] %s3104_s11 }
   0x5   :  { %3127 = sst [smem:[#allocation26_spill]] %s3106_s13 }
   0x6   :  { %3128 = sst [smem:[#allocation27_spill]] %s3107_s14 }
   0x7   :  { %3129 = sst [smem:[#allocation28_spill]] %s3108_s15 }
   0x8   :  { %3130 = sst [smem:[#allocation29_spill]] %s3109_s16 }
   0x9   :  { %21 = vsyncpa [#allocation3], 0 }
   0xa   :  { %23 = vsyncpa [#allocation3 + $0x1], 0 }
   0xb   :  { %24 = vsyncpa [#allocation6], 0 }
   0xc   :  { %26 = vsyncpa [#allocation6 + $0x1], 0 }
   0xd   :  { %27 = vsyncpa [#allocation9], 0 }
   0xe   :  { %28 = vsyncpa [#allocation4], 0 }
   0xf   :  { %30 = vsyncpa [#allocation4 + $0x1], 0  ;;  %s2632_s21 = smov 0   ;;  %s2634_s22 = smov 0  }
  0x10   :  { %s2636_s23 = smov 0   ;;  %s2638_s24 = smov 0  }
  0x11 LB: > { %3131 = sst [smem:[#allocation16_spill]] %s2513_s21  ;;  %s2653_s25 = sadd.s32 4294967295, %s2525_s24   ;;  %s2525_s24 = sphi %s2638_s24, %s3164_s24   ;;  %s2521_s23 = sphi %s2636_s23, %s3166_s23   ;;  %s2517_s22 = sphi %s2634_s22, %s3168_s22   ;;  %s2513_s21 = sphi %s2632_s21, %s3167_s21  }
  0x12   : > { %3132 = sst [smem:[#allocation17_spill]] %s2521_s23  ;;  %s1973_s26 = sadd.s32 4294967294, %s2525_s24  }
  0x13   : > { %p56_p0 = scmp.ne.s32.totalorder %s2517_s22, %s2513_s21  ;;  %p3114_p1 = scmp.eq.s32.totalorder %s2653_s25, 0 }
  0x14   : > { %p406_p3 = scmp.eq.s32.totalorder %s1973_s26, 1  ;;  %p1974_p5 = scmp.ge.s32.totalorder %s2525_s24, 1 }
  0x15   : > { %p2662_p4 = por %p3114_p1, %p56_p0  ;;  %p413_p7 = scmp.lt.s32.totalorder %s2525_s24, 3 }
  0x16   : > { %p2667_p6 = por %p406_p3, %p56_p0  ;;  %s2527_s30 = smov [#allocation7]  }
  0x17   : > { %s3133_s27 = scalar_select %p2662_p4, 1, 0 }
  0x18   : > { %s3134_s28 = scalar_select %p2667_p6, 1, 0 }
  0x19   : > { %p2672_p8 = pnand %p1974_p5, %p413_p7  ;;  %s440_s0 = sshll.u32 %s2527_s30, 4  ;;  %s2676_s0 = int_to_ptr.vmem [resolvable:$true] %s440_s0 }
  0x1a   : > { %3135 = sst [smem:[#allocation18_spill]] %s3134_s28  ;;  %s2528_s18 = smov [#allocation8]  }
  0x1b   : > { %s3136_s29 = scalar_select %p2672_p8, 1, 0 }
  0x1c   : > { %p2238_p9 = pneg %p2672_p8  ;;  %s453_s19 = sshll.u32 %s2528_s18, 4  ;;  %s2687_s19 = int_to_ptr.vmem [resolvable:$true] %s453_s19 }
  0x1d   : > { %s3138_s7 = sld [smem:[#allocation23_spill]] }
  0x1e   : > { %p2683_p11 = pnand %p2238_p9, %p3114_p1 }
  0x20   : > { %p2333_p13 = pneg %p2683_p11 }
  0x23   : > { %s2331_s30 = scalar_lea.hbm %s3138_s7, 512 }
  0x24   : > { %p2332_p12 = scmp.ne.s32.totalorder %s3138_s7, %s2331_s30  ;;  %p2338_p5 = scmp.lt.u32.totalorder %s2331_s30, %s3138_s7 }
  0x26   : > { %p2334_p0 = pnand %p2333_p13, %p2332_p12 }
  0x28   : > { %p2335_p3 = pneg %p2334_p0 }
  0x2a   : > { %p2340_p7 = pnand %p2338_p5, %p2335_p3 }
  0x2c   : > { %2343 = shalt.err (!%p2340_p7)
}
  0x2d   : > { %s2344_s18 = scalar_lea.vmem %s2676_s0, 512  ;;  %p2352_p2 = scmp.lt.s32.totalorder %s2676_s0, %s2676_s0 }
  0x2e   : > { %p2345_p9 = scmp.ne.s32.totalorder %s2676_s0, %s2344_s18  ;;  %p2353_p12 = scmp.lt.s32.totalorder %s2344_s18, %s2344_s18 }
  0x30   : > { %p2347_p10 = pnand %p2345_p9, %p2333_p13  ;;  %p2354_p0 = por %p2353_p12, %p2352_p2 }
  0x32   : > { %p2348_p1 = pneg %p2347_p10 }
  0x34   : > { %p2355_p6 = pnand %p2354_p0, %p2348_p1 }
  0x36   : > { %2358 = shalt.err (!%p2355_p6)
}
  0x37   : > { %s2529_s15 = smov 128   ;;  %s2530_s16 = smov 8  }
  0x38   : > { %2241 = dma.hbm_to_vmem [thread:$0]  (!%p2683_p11), %s3138_s7, 512, %s2676_s0, [#allocation6], %s2529_s15, %s2529_s15, %s2530_s16  }
  0x39   : > { %s3139_s8 = sld [smem:[#allocation24_spill]] }
  0x3f   : > { %s2359_s30 = scalar_lea.hbm %s3139_s8, 512 }
  0x40   : > { %p2360_p2 = scmp.ne.s32.totalorder %s3139_s8, %s2359_s30  ;;  %p2366_p10 = scmp.lt.u32.totalorder %s2359_s30, %s3139_s8 }
  0x42   : > { %p2362_p1 = pnand %p2360_p2, %p2333_p13 }
  0x44   : > { %p2363_p6 = pneg %p2362_p1 }
  0x46   : > { %p2368_p3 = pnand %p2366_p10, %p2363_p6 }
  0x48   : > { %2371 = shalt.err (!%p2368_p3)
}
  0x49   : > { %s2372_s0 = scalar_lea.vmem %s2687_s19, 512  ;;  %p2380_p12 = scmp.lt.s32.totalorder %s2687_s19, %s2687_s19 }
  0x4a   : > { %p2373_p5 = scmp.ne.s32.totalorder %s2687_s19, %s2372_s0  ;;  %p2381_p0 = scmp.lt.s32.totalorder %s2372_s0, %s2372_s0 }
  0x4c   : > { %p2375_p7 = pnand %p2373_p5, %p2333_p13  ;;  %p2382_p2 = por %p2381_p0, %p2380_p12 }
  0x4e   : > { %p2376_p9 = pneg %p2375_p7 }
  0x50   : > { %p2383_p1 = pnand %p2382_p2, %p2376_p9 }
  0x52   : > { %2386 = shalt.err (!%p2383_p1)
}
  0x53   : > { %2244 = dma.hbm_to_vmem [thread:$0]  (!%p2683_p11), %s3139_s8, 512, %s2687_s19, [#allocation9], %s2529_s15, %s2529_s15, %s2530_s16  }
  0x54   : > { %s2742_s14 = sadd.s32 1, %s2525_s24   ;;  %s43_s17 = sadd.s32 1, %s2521_s23 }
  0x55   : > { %3140 = sst [smem:[#allocation19_spill]] %s2742_s14  ;;  %s40_s21 = ssub.s32 %s2525_s24, %s2742_s14 }
  0x56   : > { %p50_p13 = scmp.ne.s32.totalorder %s2521_s23, %s2517_s22  ;;  %p41_p6 = scmp.eq.s32.totalorder %s40_s21, 0 }
  0x57   : > { %p51_p10 = scmp.eq.s32.totalorder %s2525_s24, 0  ;;  %p3141_p3 = scmp.eq.s32.totalorder %s2653_s25, 1 }
  0x58   : > { %p2258_p7 = scmp.lt.s32.totalorder %s2525_s24, 2  ;;  %s488_s26 = sand.u32 1, %s2521_s23  }
  0x59   : > { %p2752_p5 = por %p3141_p3, %p50_p13  ;;  %p52_p9 = por %p51_p10, %p50_p13 }
  0x5a   : > { %s2758_s20 = scalar_select %p41_p6, %s2521_s23, %s43_s17  }
  0x5b   : > { %s3142_s28 = scalar_select %p2752_p5, 1, 0 }
  0x5c   : > { %3144 = sst [smem:[#allocation21_spill]] %s2758_s20  ;;  %s2761_s19 = sshll.u32 %s488_s26, 3 }
  0x5d   : > { %3143 = sst [smem:[#allocation20_spill]] %s3142_s28  ;;  %s1979_s15 = sshll.u32 %s2525_s24, 7 }
  0x5e   : > { %s3145_s18 = sld [smem:[#allocation22_spill]]  ;;  %s492_s11 = scalar_lea.vmem [#allocation2], %s2761_s19 }
  0x5f   : > { %s499_s13 = sshll.u32 %s492_s11, 4  ;;  %p2772_p11 = pnand %p2258_p7, %p52_p9  ;;  %s2770_s13 = int_to_ptr.vmem [resolvable:$true] %s499_s13 }
  0x60   : > { %s2779_s16 = scalar_lea.hbm %s3094_s1, %s1979_s15  ;;  %s506_s30 = sand.u32 1, %s2525_s24  }
  0x61   : > { %s489_s8 = scalar_lea.sflag [#allocation3], %s488_s26  ;;  %p2389_p0 = pneg %p2772_p11 }
  0x64   : > { %s2767_s0 = scalar_lea.hbm %s3145_s18, %s1979_s15  ;;  %s2392_s14 = scalar_lea.hbm %s3145_s18, 256 }
  0x65   : > { %s2387_s20 = scalar_lea.hbm %s2767_s0, 128  ;;  %p2393_p13 = scmp.lt.u32.totalorder %s2767_s0, %s3145_s18 }
  0x66   : > { %p2388_p12 = scmp.ne.s32.totalorder %s2767_s0, %s2387_s20  ;;  %p2394_p6 = scmp.lt.u32.totalorder %s2392_s14, %s2387_s20 }
  0x67   : > { %p2396_p3 = scmp.lt.u32.totalorder %s2387_s20, %s2767_s0 }
  0x68   : > { %p2390_p2 = pnand %p2389_p0, %p2388_p12  ;;  %p2395_p10 = por %p2394_p6, %p2393_p13 }
  0x6a   : > { %p2391_p1 = pneg %p2390_p2  ;;  %p2397_p7 = por %p2396_p3, %p2395_p10 }
  0x6c   : > { %p2398_p9 = pnand %p2397_p7, %p2391_p1 }
  0x6e   : > { %2401 = shalt.err (!%p2398_p9)
}
  0x6f   : > { %s2402_s26 = scalar_lea.vmem %s2770_s13, 128  ;;  %s2531_s23 = smov [#allocation2]  }
  0x70   : > { %p2403_p12 = scmp.ne.s32.totalorder %s2770_s13, %s2402_s26  ;;  %s2407_s15 = sshll.u32 %s2531_s23, 4  ;;  %s2408_s15 = int_to_ptr.vmem [resolvable:$false] %s2407_s15 }
  0x71   : > { %s2409_s28 = scalar_lea.vmem %s2408_s15, 256  ;;  %p2410_p4 = scmp.lt.s32.totalorder %s2770_s13, %s2408_s15 }
  0x72   : > { %p2405_p2 = pnand %p2403_p12, %p2389_p0  ;;  %p2411_p13 = scmp.lt.s32.totalorder %s2409_s28, %s2402_s26 }
  0x74   : > { %p2406_p5 = pneg %p2405_p2  ;;  %p2412_p6 = por %p2411_p13, %p2410_p4 }
  0x76   : > { %p2413_p10 = pnand %p2412_p6, %p2406_p5 }
  0x78   : > { %2416 = shalt.err (!%p2413_p10)
}
  0x79   : > { %2248 = dma.hbm_to_vmem [thread:$0]  (!%p2772_p11), %s2767_s0, 128, %s2770_s13, %s489_s8  }
  0x7a   : > { %s510_s14 = scalar_lea.vmem [#allocation5], %s2761_s19  ;;  %s507_s21 = scalar_lea.sflag [#allocation6], %s506_s30 }
  0x7b   : > { %s517_s20 = sshll.u32 %s510_s14, 4  ;;  %s2417_s11 = scalar_lea.hbm %s2779_s16, 128  ;;  %s518_s20 = int_to_ptr.vmem [resolvable:$true] %s517_s20 }
  0x7c   : > { %p2418_p4 = scmp.ne.s32.totalorder %s2779_s16, %s2417_s11  ;;  %s2422_s23 = scalar_lea.hbm %s3094_s1, 256 }
  0x7d   : > { %p2423_p3 = scmp.lt.u32.totalorder %s2779_s16, %s3094_s1  ;;  %p2424_p7 = scmp.lt.u32.totalorder %s2422_s23, %s2417_s11 }
  0x7e   : > { %p2420_p5 = pnand %p2418_p4, %p2389_p0  ;;  %p2426_p12 = scmp.lt.u32.totalorder %s2417_s11, %s2779_s16 }
  0x7f   : > { %p2425_p9 = por %p2424_p7, %p2423_p3 }
  0x80   : > { %p2421_p1 = pneg %p2420_p5 }
  0x81   : > { %p2427_p2 = por %p2426_p12, %p2425_p9 }
  0x83   : > { %p2428_p13 = pnand %p2427_p2, %p2421_p1 }
  0x85   : > { %2431 = shalt.err (!%p2428_p13)
}
  0x86   : > { %s2432_s8 = scalar_lea.vmem %s518_s20, 128  ;;  %s2532_s19 = smov [#allocation5]  }
  0x87   : > { %p2433_p6 = scmp.ne.s32.totalorder %s518_s20, %s2432_s8  ;;  %s2437_s0 = sshll.u32 %s2532_s19, 4  ;;  %s2438_s0 = int_to_ptr.vmem [resolvable:$false] %s2437_s0 }
  0x88   : > { %s2439_s13 = scalar_lea.vmem %s2438_s0, 256  ;;  %p2440_p5 = scmp.lt.s32.totalorder %s518_s20, %s2438_s0 }
  0x89   : > { %p2435_p10 = pnand %p2433_p6, %p2389_p0  ;;  %p2441_p8 = scmp.lt.s32.totalorder %s2439_s13, %s2432_s8 }
  0x8b   : > { %p2436_p4 = pneg %p2435_p10  ;;  %p2442_p3 = por %p2441_p8, %p2440_p5 }
  0x8d   : > { %p2443_p7 = pnand %p2442_p3, %p2436_p4 }
  0x8f   : > { %2446 = shalt.err (!%p2443_p7)
}
  0x90   : > { %2251 = dma.hbm_to_vmem [thread:$0]  (!%p2772_p11), %s2779_s16, 128, %s518_s20, %s507_s21  }
  0x91   : > { %p3147_p1 = scmp.ne.s32.totalorder %s3136_s29, 0 }
  0x92   : > { %s2832_s30 = sand.u32 (!%p3147_p1), 1, %s2517_s22   ;;  %p3148_p8 = scmp.ne.s32.totalorder (!%p3147_p1), %s3133_s27, 0 }
  0x93   : > { %526 = sbr.rel (%p3147_p1) target bundleno = 2479 (0x9af), region = 84  ;;  %s2835_s14 = sshll.u32 (!%p3147_p1), %s2832_s30, 3 }
  0x94   : > { %s529_s11 = scalar_lea.sflag (!%p3147_p1), [#allocation3], %s2832_s30  ;;  %s532_s7 = scalar_lea.vmem (!%p3147_p1), [#allocation2], %s2835_s14 }
  0x9a   : > { %2492 = dma.done.wait (%p3148_p8), %s529_s11, 128  }
  0x9b   : > { %2494 = vsyncadd (%p3148_p8), %s529_s11, 4294967168  ;;  %s537_s29 = sand.u32 1, %s2653_s25   ;;  %s541_s16 = scalar_lea.vmem [#allocation5], %s2835_s14 }
  0x9c   : > { %s538_s17 = scalar_lea.sflag [#allocation6], %s537_s29 }
  0x9d   : > { %2496 = dma.done.wait (%p3148_p8), %s538_s17, 128  }
  0x9e   : > { %2498 = vsyncadd (%p3148_p8), %s538_s17, 4294967168  ;;  %p3149_p11 = scmp.eq.s32.totalorder %s2653_s25, 0 }
  0xa0   : > { %2500 = dma.done.wait (%p3149_p11), [#allocation6], 512   ;;  %p3150_p0 = pmov %p3149_p11 }
  0xa2   : > { %2502 = vsyncadd (%p3150_p0), [#allocation6], 4294966784  ;;  %p3151_p9 = pmov %p3150_p0 }
  0xa3   : > { %p3152_p12 = pmov %p3150_p0 }
  0xa4   : > { %2504 = dma.done.wait (%p3151_p9), [#allocation9], 512  }
  0xa5   : > { %2506 = vsyncadd (%p3152_p12), [#allocation9], 4294966784  ;;  %v2533_v0 = vmov 0.0|0.0   ;;  %vm2534_vm0 = vmmov 0   ;;  %v2535_v1 = vmov 0.0   ;;  %v690_v2 = vld [vmem:[%s3096_s3] sm:$0xff] }
  0xa6   : > { %2188 = vmatprep.subr.bf16.mxu1 %v2533_v0  ;;  %2182 = vmatprep.subr.bf16.mxu0 %v2533_v0  ;;  %v691_v3 = vld [vmem:[%s3096_s3 + $0x8] sm:$0xff]  ;;  %v605_v4 = vld [vmem:[%s3095_s2] sm:$0xff]  ;;  %v692_v7 = vld [vmem:[%s3096_s3 + $0x10] sm:$0xff]  ;;  %vm616_vm1 = vcmask 261120   ;;  %vm774_vm2 = vcmask 64512   ;;  %s2536_s23 = smov 120  }
  0xa7   : > { %2087 = vmatprep.mubr.msk.f32.mxu1 %vm2534_vm0, %v2535_v1  ;;  %2076 = vmatprep.mubr.msk.f32.mxu0 %vm2534_vm0, %v2535_v1  ;;  %v2189_v5 = vpack.c.bf16 %v691_v3, %v690_v2  ;;  %v606_v6 = vld [vmem:[%s3095_s2 + $0x8] sm:$0xff]  ;;  %v693_v8 = vld [vmem:[%s3096_s3 + $0x18] sm:$0xff]  ;;  %v607_v10 = vld [vmem:[%s3095_s2 + $0x10] sm:$0xff]  ;;  %s2537_s15 = smov 112   ;;  %s2538_s28 = smov 104   ;;  %vm1450_vm3 = vcmask 130048  }
  0xa8   : > { %v2183_v9 = vpack.c.bf16 %v606_v6, %v605_v4  ;;  %v608_v11 = vld [vmem:[%s3095_s2 + $0x18] sm:$0xff]  ;;  %v2192_v12 = vpack.c.bf16 %v693_v8, %v692_v7  ;;  %v603_v15 = vld [vmem:[%s532_s7] sm:$0xff]  ;;  %s2539_s8 = smov 88   ;;  %s2540_s19 = smov 96   ;;  %vm1452_vm4 = vcmask 195584   ;;  %vm1692_vm5 = vcmask 523264  }
  0xa9   : > { %2190 = vmatpush3.bf16.msra.mxu1 %v2189_v5  ;;  %v2186_v13 = vpack.c.bf16 %v608_v11, %v607_v10  ;;  %v2891_v14 = vld [vmem:[%s541_s16] sm:$0xff]  ;;  %v1990_v16 = vld [vmem:[%s3098_s5] ss:$0 sm:$0xff]  ;;  %s2541_s0 = smov 72   ;;  %s2542_s13 = smov 80  }
  0xaa   : > { %2184 = vmatpush3.bf16.msra.mxu0 %v2183_v9  ;;  %2191 = vmatprep.subr.bf16.mxu1 %v2533_v0  ;;  %v1988_v17 = vld [vmem:[%s3097_s4] ss:$0 sm:$0xff]  ;;  %s2543_s26 = smov 8   ;;  %s3153_s29 = sld [smem:[#allocation25_spill]] }
  0xab   : > { %2185 = vmatprep.subr.bf16.mxu0 %v2533_v0  ;;  %s3154_s20 = sld [smem:[#allocation26_spill]]  ;;  %s3155_s16 = sld [smem:[#allocation20_spill]] }
  0xac   : > { %s1848_s27 = scalar_lea.sflag [#allocation4], %s2832_s30 }
  0xad   : > { %2193 = vmatpush3.bf16.msra.mxu1 %v2192_v12  ;;  %v1454_v12 = vld [vmem:[%s3099_s6] sm:$0xff] }
  0xae   : > { %2187 = vmatpush3.bf16.msra.mxu0 %v2186_v13  ;;  %2105 = vmatprep.subr.mxu1 %v2535_v1  ;;  %v1455_v13 = vld [vmem:[%s3099_s6 + $0x8] sm:$0xff] }
  0xaf   : > { %2090 = vmatprep.subr.mxu0 %v2535_v1 }
  0xb0   : > { %2088 = vmatmul.mubr.msk.f32.vlgmr.msra.gmra.mrb[0].mxu1 %vm616_vm1, %v2891_v14 }
  0xb1   : > { %2077 = vmatmul.mubr.msk.f32.vlgmr.msra.gmra.mrb[0].mxu0 %vm616_vm1, %v603_v15  ;;  %2107 = vmatprep.mubr.msk.f32.mxu1 %vm2534_vm0, %v2535_v1  ;;  %v2195_v15 = vpack.c.bf16 %v1455_v13, %v1454_v12  ;;  %p3159_p13 = scmp.ne.s32.totalorder %s3155_s16, 0 }
  0xb2   : > { %2092 = vmatprep.mubr.msk.f32.mxu0 %vm2534_vm0, %v2535_v1 }
 0x183   : > { %v770_v18 = vpop.f32.mrb[0].mxu1 }
 0x184   : > { %v2910_v19 = vadd.f32 %v1990_v16, %v770_v18  ;;  %v2089_v20 = vpop.f32.mrb[1].mxu1  ;;  %v686_v21 = vpop.f32.mrb[0].mxu0  ;;  %v1456_v16 = vld [vmem:[%s3099_s6 + $0x10] sm:$0xff] }
 0x185   : > { %v687_v22 = vadd.f32 %v1988_v17, %v686_v21  ;;  %v2078_v23 = vpop.f32.mrb[1].mxu0  ;;  %v1457_v17 = vld [vmem:[%s3099_s6 + $0x18] sm:$0xff]  ;;  %v1535_v20 = vld [vmem:[#allocation8] sm:$0xff]  ;;  %v1536_v21 = vld [vmem:[#allocation8 + $0x8] sm:$0xff] }
 0x186   : > { %941 = vrot.lane.b32.xlu1 %v2910_v19, %s2536_s23  ;;  %2091 = vmatpush3.xpose.msk.msra.mxu0 %vm774_vm2, %v2910_v19 }
 0x187   : > { %2095 = vmatprep.subr.mxu0 %v2535_v1 }
 0x189   : > { %2093 = vmatmul.mubr.msk.f32.vlgmr.msra.gmra.mrb[2].mxu0 %vm774_vm2, %v687_v22 }
 0x18a   : > { %939 = vrot.lane.b32.xlu1 %v687_v22, %s2536_s23  ;;  %2097 = vmatprep.mubr.msk.f32.mxu0 %vm2534_vm0, %v2535_v1  ;;  %s2544_s23 = smov 16  }
 0x18e   : > { %1107 = vrot.lane.b32.xlu1 %v2910_v19, %s2537_s15 }
 0x192   : > { %1105 = vrot.lane.b32.xlu1 %v687_v22, %s2537_s15  ;;  %s2545_s15 = smov 24  }
 0x196   : > { %1273 = vrot.lane.b32.xlu1 %v2910_v19, %s2538_s28 }
 0x19a   : > { %1271 = vrot.lane.b32.xlu1 %v687_v22, %s2538_s28  ;;  %s3157_s28 = sld [smem:[#allocation28_spill]] }
 0x19e   : > { %1027 = vrot.lane.b32.xlu1 %v2910_v19, %s2539_s8  ;;  %s2015_s8 = sshll.u32 %s2653_s25, 7  ;;  %s2546_s25 = smov [#allocation10]  }
 0x1f8   : > { %v942_v24 = vpop.permute.xlu1 %941 }
 0x1fc   : > { %v940_v25 = vpop.permute.xlu1 %939 }
 0x200   : > { %v1108_v26 = vpop.permute.xlu1 %1107 }
 0x204   : > { %v1106_v27 = vpop.permute.xlu1 %1105 }
 0x208   : > { %v1274_v28 = vpop.permute.xlu1 %1273 }
 0x20c   : > { %v1272_v29 = vpop.permute.xlu1 %1271 }
 0x210   : > { %v1028_v30 = vpop.permute.xlu1 %1027 }
 0x211   : > { %2106 = vmatpush3.msra.mxu1 %v1028_v30 }
 0x212   : > { %2115 = vmatprep.subr.mxu1 %v2535_v1 }
 0x25c   : > { %v847_v31 = vpop.f32.mrb[2].mxu0 }
 0x25d   : > { %v851_v32 = vmul.f32 0.35355338, %v847_v31  ;;  %v2094_v33 = vpop.f32.mrb[3].mxu0 }
 0x25f   : > { %v852_v34 = vsel %vm774_vm2, %v851_v32, -inf }
 0x260   : > { %853 = vmax.xlane.f32.xlu0 %v852_v34 }
 0x276   : > { %861 = vrot.lane.b32.xlu0 %v2910_v19, %s2540_s19  ;;  %s602_s19 = scalar_lea.vmem [#allocation10], %s2835_s14  ;;  %s2451_s14 = sshll.u32 %s2546_s25, 4  ;;  %s2452_s14 = int_to_ptr.vmem [resolvable:$false] %s2451_s14 }
 0x277   : > { %s2453_s21 = scalar_lea.vmem %s2452_s14, 256 }
 0x2ed   : > { %v854_v35 = vpop.xlane.xlu0 %853 }
 0x2ee   : > { %v855_v36 = vsub.f32 %v851_v32, %v854_v35 }
 0x2f0   : > { %v856_v37 = vmul.f32 1.442695, %v855_v36 }
 0x2f1   : > { %v862_v38 = vpop.permute.xlu0 %861 }
 0x2f2   : > { %2311 = vpow2.f32 %v856_v37  ;;  %2096 = vmatpush3.msra.mxu0 %v862_v38 }
 0x2f3   : > { %2100 = vmatprep.subr.mxu0 %v2535_v1 }
 0x2fc   : > { %v2312_v39 = vpop.eup %2311 }
 0x2fd   : > { %2098 = vmatmul.mubr.msk.f32.vlgmr.msra.gmra.mrb[4].mxu0 %vm774_vm2, %v2312_v39  ;;  %v858_v6 = vsel %vm774_vm2, %v2312_v39, 0.0 }
 0x2fe   : > { %2101 = vmatpush3.xpose.msk.msra.mxu0 %vm774_vm2, %v942_v24  ;;  %2102 = vmatprep.mubr.msk.f32.mxu0 %vm2534_vm0, %v2535_v1  ;;  %v2201_v24 = vpack.c.bf16 %v1536_v21, %v1535_v20 }
 0x2ff   : > { %2110 = vmatprep.subr.mxu0 %v2535_v1 }
 0x301   : > { %2103 = vmatmul.mubr.msk.f32.vlgmr.msra.gmra.mrb[6].mxu0 %vm774_vm2, %v940_v25 }
 0x302   : > { %2111 = vmatpush3.xpose.msk.msra.mxu0 %vm774_vm2, %v1108_v26  ;;  %2112 = vmatprep.mubr.msk.f32.mxu0 %vm2534_vm0, %v2535_v1 }
 0x303   : > { %2120 = vmatprep.subr.mxu0 %v2535_v1 }
 0x305   : > { %2113 = vmatmul.mubr.msk.f32.vlgmr.msra.gmra.mrb[8].mxu0 %vm774_vm2, %v1106_v27  ;;  %v1537_v27 = vld [vmem:[#allocation8 + $0x10] sm:$0xff] }
 0x306   : > { %2121 = vmatpush3.xpose.msk.msra.mxu0 %vm774_vm2, %v1274_v28  ;;  %2122 = vmatprep.mubr.msk.f32.mxu0 %vm2534_vm0, %v2535_v1  ;;  %v1538_v28 = vld [vmem:[#allocation8 + $0x18] sm:$0xff] }
 0x307   : > { %2194 = vmatprep.subr.bf16.mxu0 %v2533_v0 }
 0x309   : > { %2123 = vmatmul.mubr.msk.f32.vlgmr.msra.gmra.mrb[10].mxu0 %vm774_vm2, %v1272_v29  ;;  %v2204_v29 = vpack.c.bf16 %v1538_v28, %v1537_v27 }
 0x30a   : > { %2138 = vmatprep.mubr.msk.f32.mxu0 %vm2534_vm0, %v2535_v1  ;;  %2196 = vmatpush3.bf16.msra.mxu0 %v2195_v15 }
 0x30b   : > { %2197 = vmatprep.subr.bf16.mxu0 %v2533_v0 }
 0x3d0   : > { %v2944_v40 = vpop.f32.mrb[4].mxu0 }
 0x3d1   : > { %v2099_v41 = vpop.f32.mrb[5].mxu0 }
 0x3d4   : > { %v1013_v42 = vpop.f32.mrb[6].mxu0 }
 0x3d5   : > { %v1017_v43 = vmul.f32 0.35355338, %v1013_v42  ;;  %v2104_v44 = vpop.f32.mrb[7].mxu0 }
 0x3d6   : > { %v1532_v44 = vld [vmem:[#allocation7 + $0x8] sm:$0xff] }
 0x3d7   : > { %v1018_v45 = vsel %vm774_vm2, %v1017_v43, -inf }
 0x3d8   : > { %1019 = vmax.xlane.f32.xlu1 %v1018_v45  ;;  %v1179_v46 = vpop.f32.mrb[8].mxu0 }
 0x3d9   : > { %v1183_v47 = vmul.f32 0.35355338, %v1179_v46  ;;  %v2114_v48 = vpop.f32.mrb[9].mxu0 }
 0x3db   : > { %v1184_v49 = vsel %vm774_vm2, %v1183_v47, -inf }
 0x3dc   : > { %1185 = vmax.xlane.f32.xlu0 %v1184_v49  ;;  %v1345_v50 = vpop.f32.mrb[10].mxu0  ;;  %v1533_v49 = vld [vmem:[#allocation7 + $0x10] sm:$0xff] }
 0x3dd   : > { %v1349_v51 = vmul.f32 0.35355338, %v1345_v50  ;;  %v2124_v52 = vpop.f32.mrb[11].mxu0  ;;  %v1534_v50 = vld [vmem:[#allocation7 + $0x18] sm:$0xff] }
 0x3de   : > { %v2210_v52 = vpack.c.bf16 %v1534_v50, %v1533_v49 }
 0x3df   : > { %v1350_v53 = vsel %vm774_vm2, %v1349_v51, -inf }
 0x3e0   : > { %1351 = vmax.xlane.f32.xlu0 %v1350_v53 }
 0x3e9   : > { %1359 = vrot.lane.b32.xlu1 %v2910_v19, %s2541_s0  ;;  %s1861_s0 = sshll.u32 %s602_s19, 4  ;;  %s3050_s0 = int_to_ptr.vmem [resolvable:$true] %s1861_s0 }
 0x3ea   : > { %p2454_p4 = scmp.lt.s32.totalorder %s3050_s0, %s2452_s14 }
 0x3f6   : > { %1193 = vrot.lane.b32.xlu0 %v2910_v19, %s2542_s13  ;;  %v2198_v19 = vpack.c.bf16 %v1457_v17, %v1456_v16 }
 0x3f8   : > { %2199 = vmatpush3.bf16.msra.mxu0 %v2198_v19 }
 0x3f9   : > { %2206 = vmatprep.subr.bf16.mxu0 %v2533_v0 }
 0x465   : > { %v1020_v54 = vpop.xlane.xlu1 %1019 }
 0x466   : > { %v1021_v55 = vsub.f32 %v1017_v43, %v1020_v54  ;;  %v1531_v43 = vld [vmem:[#allocation7] sm:$0xff] }
 0x468   : > { %v1022_v56 = vmul.f32 1.442695, %v1021_v55 }
 0x469   : > { %v1186_v57 = vpop.xlane.xlu0 %1185  ;;  %v1360_v5 = vpop.permute.xlu1 %1359 }
 0x46a   : > { %2313 = vpow2.f32 %v1022_v56  ;;  %v1187_v58 = vsub.f32 %v1183_v47, %v1186_v57  ;;  %v2207_v47 = vpack.c.bf16 %v1532_v44, %v1531_v43  ;;  %v2007_v57 = vld [vmem:[%s3102_s9] ss:$0 sm:$0xff] }
 0x46c   : > { %v1188_v59 = vmul.f32 1.442695, %v1187_v58 }
 0x46d   : > { %v1352_v60 = vpop.xlane.xlu0 %1351 }
 0x46e   : > { %2315 = vpow2.f32 %v1188_v59  ;;  %v1353_v61 = vsub.f32 %v1349_v51, %v1352_v60 }
 0x470   : > { %v1354_v62 = vmul.f32 1.442695, %v1353_v61 }
 0x471   : > { %v1194_v2 = vpop.permute.xlu0 %1193 }
 0x472   : > { %2317 = vpow2.f32 %v1354_v62 }
 0x474   : > { %v2314_v63 = vpop.eup %2313 }
 0x475   : > { %2108 = vmatmul.mubr.msk.f32.vlgmr.msra.gmra.mrb[2].mxu1 %vm774_vm2, %v2314_v63  ;;  %v1024_v3 = vsel %vm774_vm2, %v2314_v63, 0.0  ;;  %v1725_v63 = vld [vmem:[%s3105_s12] sm:$0xff] }
 0x476   : > { %2116 = vmatpush3.msra.mxu1 %v1194_v2  ;;  %1025 = vadd.xlane.f32.xlu1 %v1024_v3  ;;  %v1726_v2 = vld [vmem:[%s3105_s12 + $0x8] sm:$0xff] }
 0x477   : > { %2117 = vmatprep.mubr.msk.f32.mxu1 %vm2534_vm0, %v2535_v1  ;;  %2125 = vmatprep.subr.mxu1 %v2535_v1  ;;  %v2213_v3 = vpack.c.bf16 %v1726_v2, %v1725_v63 }
 0x478   : > { %v2316_v4 = vpop.eup %2315 }
 0x479   : > { %2118 = vmatmul.mubr.msk.f32.vlgmr.msra.gmra.mrb[4].mxu1 %vm774_vm2, %v2316_v4  ;;  %v1190_v7 = vsel %vm774_vm2, %v2316_v4, 0.0  ;;  %v1727_v4 = vld [vmem:[%s3105_s12 + $0x10] sm:$0xff] }
 0x47a   : > { %2126 = vmatpush3.msra.mxu1 %v1360_v5  ;;  %859 = vadd.xlane.f32.xlu1 %v858_v6  ;;  %v1728_v5 = vld [vmem:[%s3105_s12 + $0x18] sm:$0xff] }
 0x47b   : > { %1191 = vadd.xlane.f32.xlu0 %v1190_v7  ;;  %2127 = vmatprep.mubr.msk.f32.mxu1 %vm2534_vm0, %v2535_v1  ;;  %v2216_v6 = vpack.c.bf16 %v1728_v5, %v1727_v4  ;;  %v1729_v7 = vld [vmem:[%s3105_s12 + $0x20] sm:$0xff] }
 0x47c   : > { %v2318_v8 = vpop.eup %2317  ;;  %2200 = vmatprep.subr.bf16.mxu1 %v2533_v0 }
 0x47d   : > { %2128 = vmatmul.mubr.msk.f32.vlgmr.msra.gmra.mrb[6].mxu1 %vm774_vm2, %v2318_v8  ;;  %v1356_v9 = vsel %vm774_vm2, %v2318_v8, 0.0  ;;  %v1730_v8 = vld [vmem:[%s3105_s12 + $0x28] sm:$0xff] }
 0x47e   : > { %2149 = vmatprep.mubr.msk.f32.mxu1 %vm2534_vm0, %v2535_v1  ;;  %2202 = vmatpush3.bf16.msra.mxu1 %v2201_v24  ;;  %v2008_v24 = vld [vmem:[%s3103_s10] ss:$0 sm:$0xff] }
 0x47f   : > { %1357 = vadd.xlane.f32.xlu0 %v1356_v9  ;;  %2203 = vmatprep.subr.bf16.mxu1 %v2533_v0  ;;  %v2219_v9 = vpack.c.bf16 %v1730_v8, %v1729_v7 }
 0x482   : > { %2205 = vmatpush3.bf16.msra.mxu1 %v2204_v29  ;;  %v2010_v29 = vld [vmem:[%s3154_s20] ss:$0 sm:$0xff]  ;;  %s2447_s20 = scalar_lea.vmem %s3050_s0, 128 }
 0x483   : > { %2212 = vmatprep.subr.bf16.mxu1 %v2533_v0  ;;  %p2448_p2 = scmp.ne.s32.totalorder %s3050_s0, %s2447_s20  ;;  %p2455_p5 = scmp.lt.s32.totalorder %s2453_s21, %s2447_s20 }
 0x485   : > { %2150 = vmatmul.mubr.msk.f32.vlgmr.msra.gmra.mrb[8].mxu1 %vm616_vm1, %v2891_v14  ;;  %p2449_p6 = pnand %p2448_p2, %p3159_p13  ;;  %p2456_p3 = por %p2455_p5, %p2454_p4 }
 0x486   : > { %2179 = vmatprep.mubr.msk.f32.mxu1 %vm2534_vm0, %v2535_v1  ;;  %2214 = vmatpush3.bf16.msra.mxu1 %v2213_v3 }
 0x487   : > { %2215 = vmatprep.subr.bf16.mxu1 %v2533_v0  ;;  %p2450_p10 = pneg %p2449_p6 }
 0x489   : > { %p2457_p7 = pnand %p2456_p3, %p2450_p10 }
 0x48a   : > { %2217 = vmatpush3.bf16.msra.mxu1 %v2216_v6 }
 0x48b   : > { %2218 = vmatprep.subr.bf16.mxu1 %v2533_v0 }
 0x48e   : > { %2220 = vmatpush3.bf16.msra.mxu1 %v2219_v9 }
 0x48f   : > { %2221 = vmatprep.subr.bf16.mxu1 %v2533_v0 }
 0x503   : > { %v1026_v10 = vpop.xlane.xlu1 %1025 }
 0x504   : > { %2319 = vrcp.f32 %v1026_v10  ;;  %v1731_v10 = vld [vmem:[%s3105_s12 + $0x30] sm:$0xff] }
 0x507   : > { %v860_v38 = vpop.xlane.xlu1 %859 }
 0x508   : > { %v1192_v11 = vpop.xlane.xlu0 %1191 }
 0x509   : > { %2321 = vrcp.f32 %v1192_v11  ;;  %v1732_v11 = vld [vmem:[%s3105_s12 + $0x38] sm:$0xff] }
 0x50a   : > { %v2222_v12 = vpack.c.bf16 %v1732_v11, %v1731_v10 }
 0x50c   : > { %v1358_v18 = vpop.xlane.xlu0 %1357  ;;  %2223 = vmatpush3.bf16.msra.mxu1 %v2222_v12 }
 0x50d   : > { %2323 = vrcp.f32 %v1358_v18 }
 0x50e   : > { %v2320_v22 = vpop.eup %2319  ;;  %2325 = vrcp.f32 %v860_v38 }
 0x513   : > { %v2322_v30 = vpop.eup %2321 }
 0x517   : > { %v2324_v34 = vpop.eup %2323 }
 0x518   : > { %v2326_v39 = vpop.eup %2325 }
 0x519   : > { %v938_v45 = vmul.f32 %v2326_v39, %v2944_v40 }
 0x548   : > { %v1099_v23 = vpop.f32.mrb[2].mxu1 }
 0x549   : > { %v1104_v25 = vmul.f32 %v2320_v22, %v1099_v23  ;;  %v2109_v26 = vpop.f32.mrb[3].mxu1 }
 0x54b   : > { %1438 = vrot.lane.b32.xlu0 %v1104_v25, %s2543_s26  ;;  %s3156_s26 = sld [smem:[#allocation27_spill]] }
 0x54c   : > { %v1265_v31 = vpop.f32.mrb[4].mxu1 }
 0x54d   : > { %v1270_v32 = vmul.f32 %v2322_v30, %v1265_v31  ;;  %v2119_v33 = vpop.f32.mrb[5].mxu1 }
 0x54f   : > { %1442 = vrot.lane.b32.xlu1 %v1270_v32, %s2544_s23 }
 0x550   : > { %v1431_v35 = vpop.f32.mrb[6].mxu1 }
 0x551   : > { %v1436_v36 = vmul.f32 %v2324_v34, %v1431_v35  ;;  %v2129_v37 = vpop.f32.mrb[7].mxu1 }
 0x553   : > { %1446 = vrot.lane.b32.xlu1 %v1436_v36, %s2545_s15 }
 0x558   : > { %v1605_v40 = vpop.f32.mrb[8].mxu1 }
 0x559   : > { %v2151_v53 = vpop.f32.mrb[9].mxu1 }
 0x5bd   : > { %v1439_v41 = vpop.permute.xlu0 %1438 }
 0x5be   : > { %v1449_v46 = vsel %vm774_vm2, %v938_v45, %v1439_v41 }
 0x5c1   : > { %v1443_v42 = vpop.permute.xlu1 %1442 }
 0x5c2   : > { %v1451_v14 = vsel %vm1450_vm3, %v1449_v46, %v1443_v42 }
 0x5c5   : > { %v1447_v48 = vpop.permute.xlu1 %1446 }
 0x5c6   : > { %v1453_v51 = vsel %vm1452_vm4, %v1451_v14, %v1447_v48  ;;  %v2013_v48 = vld [vmem:[%s3157_s28] ss:$0 sm:$0xff] }
 0x5c7   : > { %2139 = vmatmul.mubr.msk.f32.vlgmr.msra.gmra.mrb[12].mxu0 %vm616_vm1, %v1453_v51 }
 0x5c8   : > { %2208 = vmatpush3.bf16.msra.mxu0 %v2207_v47  ;;  %2160 = vmatprep.mubr.msk.f32.mxu0 %vm2534_vm0, %v2535_v1  ;;  %v2012_v47 = vld [vmem:[%s3156_s26] ss:$0 sm:$0xff] }
 0x5c9   : > { %2209 = vmatprep.subr.bf16.mxu0 %v2533_v0  ;;  %v2009_v0 = vld [vmem:[%s3153_s29] ss:$0 sm:$0xff]  ;;  %s3158_s29 = sld [smem:[#allocation29_spill]] }
 0x5cc   : > { %2211 = vmatpush3.bf16.msra.mxu0 %v2210_v52 }
 0x5cf   : > { %s3048_s17 = scalar_lea.hbm %s3158_s29, %s2015_s8 }
 0x69a   : > { %v1527_v54 = vpop.f32.mrb[12].mxu0 }
 0x69b   : > { %v2140_v55 = vpop.f32.mrb[13].mxu0  ;;  %2161 = vmatmul.mubr.msk.f32.vlgmr.msra.gmra.mrb[14].mxu0 %vm616_vm1, %v1527_v54 }
 0x76e   : > { %v1678_v56 = vpop.f32.mrb[14].mxu0 }
 0x76f   : > { %v1679_v58 = vadd.f32 %v1678_v56, %v1605_v40  ;;  %v2162_v59 = vpop.f32.mrb[15].mxu0 }
 0x771   : > { %v1689_v60 = vadd.f32 %v2007_v57, %v1679_v58 }
 0x773   : > { %v1693_v1 = vsel %vm1692_vm5, %v1689_v60, 0.0  ;;  %v1698_v61 = vmul.f32 %v1689_v60, %v1689_v60 }
 0x774   : > { %1694 = vadd.xlane.f32.xlu0 %v1693_v1 }
 0x775   : > { %v1699_v62 = vsel %vm1692_vm5, %v1698_v61, 0.0 }
 0x776   : > { %1700 = vadd.xlane.f32.xlu1 %v1699_v62 }
 0x801   : > { %v1695_v13 = vpop.xlane.xlu0 %1694 }
 0x802   : > { %v1697_v15 = vmul.f32 0.015625, %v1695_v13 }
 0x803   : > { %v1701_v16 = vpop.xlane.xlu1 %1700 }
 0x804   : > { %v1703_v17 = vmul.f32 %v1697_v15, %v1697_v15  ;;  %v1702_v18 = vmul.f32 0.015625, %v1701_v16  ;;  %v1706_v22 = vsub.f32 %v1689_v60, %v1697_v15 }
 0x806   : > { %v1704_v19 = vsub.f32 %v1702_v18, %v1703_v17 }
 0x808   : > { %v1705_v20 = vmax.f32 %v1704_v19, 0.0 }
 0x80a   : > { %v1707_v21 = vadd.f32 1e-05, %v1705_v20 }
 0x80c   : > { %2327 = vrsqrt.f32 %v1707_v21 }
 0x816   : > { %v2328_v23 = vpop.eup %2327 }
 0x817   : > { %v1709_v25 = vmul.f32 %v2328_v23, %v1706_v22 }
 0x819   : > { %v1716_v26 = vmul.f32 %v2008_v24, %v1709_v25 }
 0x81b   : > { %v1723_v27 = vadd.f32 %v2009_v0, %v1716_v26 }
 0x81d   : > { %v1724_v28 = vmax.f32 %v1723_v27, 0.0 }
 0x81f   : > { %2180 = vmatmul.mubr.msk.f32.vlgmr.msra.gmra.mrb[10].mxu1 %vm1692_vm5, %v1724_v28 }
 0x8f2   : > { %v1809_v30 = vpop.f32.mrb[10].mxu1 }
 0x8f3   : > { %v1810_v31 = vadd.f32 %v2010_v29, %v1809_v30  ;;  %v2181_v32 = vpop.f32.mrb[11].mxu1 }
 0x8f5   : > { %v1815_v33 = vsel %vm616_vm1, %v1810_v31, 0.0  ;;  %v1820_v34 = vmul.f32 %v1810_v31, %v1810_v31 }
 0x8f6   : > { %1816 = vadd.xlane.f32.xlu0 %v1815_v33 }
 0x8f7   : > { %v1821_v35 = vsel %vm616_vm1, %v1820_v34, 0.0 }
 0x8fa   : > { %1822 = vadd.xlane.f32.xlu0 %v1821_v35 }
 0x983   : > { %v1817_v36 = vpop.xlane.xlu0 %1816 }
 0x984   : > { %v1819_v37 = vmul.f32 0.03125, %v1817_v36 }
 0x986   : > { %v1825_v39 = vmul.f32 %v1819_v37, %v1819_v37  ;;  %v1828_v45 = vsub.f32 %v1810_v31, %v1819_v37 }
 0x987   : > { %v1823_v38 = vpop.xlane.xlu0 %1822 }
 0x988   : > { %v1824_v41 = vmul.f32 0.03125, %v1823_v38 }
 0x98a   : > { %v1826_v42 = vsub.f32 %v1824_v41, %v1825_v39 }
 0x98c   : > { %v1827_v43 = vmax.f32 %v1826_v42, 0.0 }
 0x98e   : > { %v1829_v44 = vadd.f32 1e-05, %v1827_v43 }
 0x990   : > { %2329 = vrsqrt.f32 %v1829_v44 }
 0x99a   : > { %v2330_v46 = vpop.eup %2329 }
 0x99b   : > { %v1831_v14 = vmul.f32 %v2330_v46, %v1828_v45 }
 0x99d   : > { %v1838_v49 = vmul.f32 %v2012_v47, %v1831_v14 }
 0x99f   : > { %v1845_v50 = vadd.f32 %v2013_v48, %v1838_v49 }
 0x9a1   : > { %1846 = vst.msk [vmem:[%s602_s19] sm:$0xff] %vm616_vm1, %v1845_v50 }
 0x9a2   : > { %2460 = shalt.err (!%p2457_p7)
}
 0x9a3   : > { %s2461_s30 = scalar_lea.hbm %s3048_s17, 128  ;;  %s2465_s23 = scalar_lea.hbm %s3158_s29, 256 }
 0x9a4   : > { %p2462_p1 = scmp.ne.s32.totalorder %s3048_s17, %s2461_s30  ;;  %p2466_p0 = scmp.lt.u32.totalorder %s3048_s17, %s3158_s29 }
 0x9a5   : > { %p2467_p9 = scmp.lt.u32.totalorder %s2465_s23, %s2461_s30  ;;  %p2469_p2 = scmp.lt.u32.totalorder %s2461_s30, %s3048_s17 }
 0x9a6   : > { %p2463_p8 = pnand %p2462_p1, %p3159_p13 }
 0x9a7   : > { %p2468_p12 = por %p2467_p9, %p2466_p0 }
 0x9a8   : > { %p2464_p11 = pneg %p2463_p8 }
 0x9a9   : > { %p2470_p6 = por %p2469_p2, %p2468_p12 }
 0x9ab   : > { %p2471_p10 = pnand %p2470_p6, %p2464_p11 }
 0x9ad   : > { %2474 = shalt.err (!%p2471_p10)
}
 0x9ae   : > { %2236 = dma.vmem_to_hbm [thread:$0]  (%p3159_p13), %s3050_s0, 128, %s3048_s17, %s1848_s27  }
 0x9af PF: > { %s3160_s8 = sld [smem:[#allocation16_spill]]  ;;  %s3161_s19 = sld [smem:[#allocation18_spill]] }
 0x9b0   : > { %p3163_p5 = scmp.ge.s32.totalorder %s2525_s24, 2 }
 0x9b5   : > { %s1873_s13 = sand.u32 1, %s3160_s8   ;;  %p3162_p4 = scmp.ne.s32.totalorder %s3161_s19, 0 }
 0x9b6   : > { %s1874_s11 = scalar_lea.sflag [#allocation4], %s1873_s13 }
 0x9b7   : > { %p2253_p3 = pnand %p3163_p5, %p3162_p4 }
 0x9b9   : > { %2508 = dma.done.wait (!%p2253_p3), %s1874_s11, 128  }
 0x9ba   : > { %2510 = vsyncadd (!%p2253_p3), %s1874_s11, 4294967168  ;;  %s3164_s24 = sld [smem:[#allocation19_spill]]  ;;  %s3165_s20 = sld [smem:[#allocation17_spill]] }
 0x9bb   : > { %s3166_s23 = sld [smem:[#allocation21_spill]]  ;;  %s3167_s21 = smov %s2517_s22 }
 0x9c0   : > { %p33_p7 = scmp.ge.s32.totalorder %s3164_s24, 4   ;;  %s3168_s22 = smov %s3165_s20 }
 0x9c2   :  { %35 = sbr.rel (!%p33_p7) target bundleno = 17 (0x11), region = 150 }
 0x9c9   :  { %1879 = vsyncpa [#allocation3], 1 }
 0x9ca   :  { %1881 = vsyncpa [#allocation3 + $0x1], 1 }
 0x9cb   :  { %1882 = vsyncpa [#allocation6], 1 }
 0x9cc   :  { %1884 = vsyncpa [#allocation6 + $0x1], 1 }
 0x9cd   :  { %1885 = vsyncpa [#allocation9], 1 }
 0x9ce   :  { %1886 = vsyncpa [#allocation4], 1 }
 0x9cf   :  { %1888 = vsyncpa [#allocation4 + $0x1], 1 }

</bundles_post_ra>
